<compile_context>
chip_gen: v7x
topology: tpu7x:2x2x1
jax: 0.10.0
libtpu: 0.0.40
codegen_flags: <defaults>
</compile_context>

<pallas_src>
import math

import jax
import jax.numpy as jnp
from jax.experimental import pallas as pl
from jax.experimental.pallas import tpu as pltpu

VOCAB = 512      # n_vocab
D = 64           # n_embd
S = 8            # n_tokens (sequence length)
H = 4            # n_head
DH = D // H      # per-head dim
N_LAYERS = 2     # number of CLIPLayers
B = 2            # batch
BS = B * S       # fused batch*seq rows
EPS = 1e-5       # nn.LayerNorm default eps


def _layer_norm(x, g, b):
    mu = jnp.mean(x, axis=-1, keepdims=True)
    var = jnp.mean(jnp.square(x - mu), axis=-1, keepdims=True)
    return (x - mu) * jax.lax.rsqrt(var + EPS) * g + b


def clip_kernel(x_ref,
                wqkv_ref, bqkv_ref, wo_ref, bo_ref,
                ln1_g_ref, ln1_b_ref, ln2_g_ref, ln2_b_ref,
                w1_ref, b1_ref, w2_ref, b2_ref,
                lnf_g_ref, lnf_b_ref,
                out_ref, x_scr):
    l = pl.program_id(0)

    @pl.when(l == 0)
    def _():
        x_scr[...] = x_ref[...]

    x = x_scr[...]                                            # (BS, D) f32

    # Causal mask (1, S, S); broadcasts over the (H*B, S, S) score tensor.
    row = jax.lax.broadcasted_iota(jnp.int32, (1, S, S), 1)
    col = jax.lax.broadcasted_iota(jnp.int32, (1, S, S), 2)
    visible = col <= row

    # ------------------------- attention block -------------------------
    residue = x
    hn = _layer_norm(x, ln1_g_ref[0], ln1_b_ref[0]).astype(jnp.bfloat16)

    # Single fused QKV projection: (BS, D) x (D, 3D) -> (BS, 3D), f32 acc.
    qkv = jnp.dot(hn, wqkv_ref[0],
                  preferred_element_type=jnp.float32) + bqkv_ref[0]

    def split_heads(base):
        # (H*B, S, DH) head-major leading batch.  Only lane slices + leading
        # reshapes/concat — no minor-dim transposes inside the kernel.
        return jnp.concatenate(
            [qkv[:, base + h * DH: base + (h + 1) * DH].reshape(B, S, DH)
             for h in range(H)], axis=0).astype(jnp.bfloat16)

    q = split_heads(0)          # 1/sqrt(DH) already folded into wq/bq
    k = split_heads(D)
    v = split_heads(2 * D)

    # Head-batched scores + one softmax covering all heads and batches.
    sc = jnp.einsum("nqd,nkd->nqk", q, k,
                    preferred_element_type=jnp.float32)       # (H*B, S, S)
    sc = jnp.where(visible, sc, -1e30)                        # finite: NaN-safe
    sc = sc - jnp.max(sc, axis=-1, keepdims=True)
    prob = jnp.exp(sc)
    prob = prob * pl.reciprocal(jnp.sum(prob, axis=-1, keepdims=True),
                                approx=True)

    o = jnp.einsum("nqk,nkd->nqd", prob.astype(jnp.bfloat16), v,
                   preferred_element_type=jnp.float32)        # (H*B, S, DH)

    # Lane-concatenate heads back to (BS, D); ONE output projection with K=D.
    o_cat = jnp.concatenate(
        [o[h * B:(h + 1) * B].reshape(BS, DH) for h in range(H)], axis=-1)
    attn = jnp.dot(o_cat.astype(jnp.bfloat16), wo_ref[0],
                   preferred_element_type=jnp.float32) + bo_ref[0]
    x = residue + attn

    # ------------------------- MLP block (quick-GELU) -------------------------
    residue = x
    hn = _layer_norm(x, ln2_g_ref[0], ln2_b_ref[0]).astype(jnp.bfloat16)
    a = jnp.dot(hn, w1_ref[0],
                preferred_element_type=jnp.float32) + b1_ref[0]   # (BS, 4D)
    a = a * jax.nn.sigmoid(1.702 * a)
    x = residue + jnp.dot(a.astype(jnp.bfloat16), w2_ref[0],
                          preferred_element_type=jnp.float32) + b2_ref[0]

    x_scr[...] = x

    @pl.when(l == pl.num_programs(0) - 1)
    def _():
        out_ref[...] = _layer_norm(x, lnf_g_ref[...], lnf_b_ref[...]
                                   ).astype(out_ref.dtype)


def init_params(key):
    ks = jax.random.split(key, 20)
    n = lambda k, shape, s=0.05: jax.random.normal(k, shape, jnp.float32) * s
    # Round matmul weights to the bf16 grid so kernel (bf16) and reference
    # (f32) use identical weight values.
    bfr = lambda a: a.astype(jnp.bfloat16).astype(jnp.float32)
    L = N_LAYERS
    return {
        "tok_emb": n(ks[0], (VOCAB, D), 0.02),
        "pos_emb": n(ks[1], (S, D), 0.02),
        "ln1_g": 1.0 + n(ks[2], (L, D), 0.1),
        "ln1_b": n(ks[3], (L, D), 0.1),
        "wq": bfr(n(ks[4], (L, D, D))),
        "wk": bfr(n(ks[5], (L, D, D))),
        "wv": bfr(n(ks[6], (L, D, D))),
        "bq": n(ks[7], (L, D)),
        "bk": n(ks[8], (L, D)),
        "bv": n(ks[9], (L, D)),
        "wo": bfr(n(ks[10], (L, D, D))),
        "bo": n(ks[11], (L, D)),
        "ln2_g": 1.0 + n(ks[12], (L, D), 0.1),
        "ln2_b": n(ks[13], (L, D), 0.1),
        "w1": bfr(n(ks[14], (L, D, 4 * D))),
        "b1": n(ks[15], (L, 4 * D)),
        "w2": bfr(n(ks[16], (L, 4 * D, D))),
        "b2": n(ks[17], (L, D)),
        "lnf_g": 1.0 + n(ks[18], (D,), 0.1),
        "lnf_b": n(ks[19], (D,), 0.1),
    }


def clip_forward(tokens, p):
    L = N_LAYERS
    scale = 1.0 / math.sqrt(DH)   # 0.25 exactly -> folding into wq/bq is lossless

    # Embedding gather + positional add = plain-JAX glue outside the kernel.
    x = p["tok_emb"][tokens.astype(jnp.int32)] + p["pos_emb"][None]   # (B,S,D)
    x = x.astype(jnp.float32).reshape(BS, D)                          # fuse batch

    bf = lambda a: a.astype(jnp.bfloat16)

    # Fused QKV weight/bias; softmax scale folded into the Q slice.
    wqkv = bf(jnp.concatenate([p["wq"] * scale, p["wk"], p["wv"]], axis=-1))  # (L,D,3D)
    bqkv = jnp.concatenate([p["bq"] * scale, p["bk"], p["bv"]],
                           axis=-1).reshape(L, 1, 3 * D)                      # f32

    args = (
        x,
        wqkv, bqkv,
        bf(p["wo"]), p["bo"].reshape(L, 1, D),
        p["ln1_g"].reshape(L, 1, D), p["ln1_b"].reshape(L, 1, D),
        p["ln2_g"].reshape(L, 1, D), p["ln2_b"].reshape(L, 1, D),
        bf(p["w1"]), p["b1"].reshape(L, 1, 4 * D),
        bf(p["w2"]), p["b2"].reshape(L, 1, D),
        p["lnf_g"].reshape(1, D), p["lnf_b"].reshape(1, D),
    )

    def per_layer(blk):
        nd = len(blk)
        return pl.BlockSpec(blk, lambda l, _nd=nd: (l,) + (0,) * (_nd - 1))

    def shared(blk):
        nd = len(blk)
        return pl.BlockSpec(blk, lambda l, _nd=nd: (0,) * _nd)

    in_specs = [
        shared((BS, D)),                 # x (block index constant -> fetched once)
        per_layer((1, D, 3 * D)),        # wqkv
        per_layer((1, 1, 3 * D)),        # bqkv
        per_layer((1, D, D)),            # wo
        per_layer((1, 1, D)),            # bo
        per_layer((1, 1, D)),            # ln1_g
        per_layer((1, 1, D)),            # ln1_b
        per_layer((1, 1, D)),            # ln2_g
        per_layer((1, 1, D)),            # ln2_b
        per_layer((1, D, 4 * D)),        # w1
        per_layer((1, 1, 4 * D)),        # b1
        per_layer((1, 4 * D, D)),        # w2
        per_layer((1, 1, D)),            # b2
        shared((1, D)),                  # lnf_g
        shared((1, D)),                  # lnf_b
    ]

    # Advisory cost estimate for XLA's scheduler around the custom call.
    flops = L * 2 * BS * D * (12 * D + 2 * S)          # qkv+scores+pv+oproj+mlp
    transc = L * (B * H * S * S + BS * 4 * D)          # softmax exp + gelu sigmoid
    w_bytes = L * (D * 3 * D + D * D + 8 * D * D) * 2  # bf16 weights
    act_bytes = 2 * BS * D * 4                         # f32 in + out
    ce = pl.CostEstimate(flops=flops, transcendentals=transc,
                         bytes_accessed=w_bytes + act_bytes)

    out = pl.pallas_call(
        clip_kernel,
        out_shape=jax.ShapeDtypeStruct((BS, D), jnp.float32),
        grid_spec=pltpu.PrefetchScalarGridSpec(
            num_scalar_prefetch=0,
            grid=(L,),                                  # layer axis: per-layer
            in_specs=in_specs,                          # weights double-buffered
            out_specs=pl.BlockSpec((BS, D), lambda l: (0, 0)),
            scratch_shapes=[pltpu.VMEM((BS, D), jnp.float32)]),
        compiler_params=pltpu.CompilerParams(
            dimension_semantics=("arbitrary",)),
        cost_estimate=ce,
    )(*args)
    return out.reshape(B, S, D)


def clip_ref(tokens, p):
    """Pure-JAX f32 reference mirroring the PyTorch forward."""
    x = p["tok_emb"][tokens.astype(jnp.int32)] + p["pos_emb"][None]
    causal = jnp.arange(S)[None, :] <= jnp.arange(S)[:, None]
    scale = 1.0 / math.sqrt(DH)
    for l in range(N_LAYERS):
        r = x
        h = _layer_norm(x, p["ln1_g"][l], p["ln1_b"][l])
        q = h @ p["wq"][l] + p["bq"][l]
        k = h @ p["wk"][l] + p["bk"][l]
        v = h @ p["wv"][l] + p["bv"][l]
        q = q.reshape(B, S, H, DH).transpose(0, 2, 1, 3)
        k = k.reshape(B, S, H, DH).transpose(0, 2, 1, 3)
        v = v.reshape(B, S, H, DH).transpose(0, 2, 1, 3)
        sc = jnp.einsum("bhqd,bhkd->bhqk", q, k)
        sc = jnp.where(causal, sc, -jnp.inf) * scale
        w = jax.nn.softmax(sc, axis=-1)
        o = jnp.einsum("bhqk,bhkd->bhqd", w, v).transpose(0, 2, 1, 3)
        o = o.reshape(B, S, D)
        x = r + (o @ p["wo"][l] + p["bo"][l])
        r = x
        h = _layer_norm(x, p["ln2_g"][l], p["ln2_b"][l])
        h = h @ p["w1"][l] + p["b1"][l]
        h = h * jax.nn.sigmoid(1.702 * h)
        h = h @ p["w2"][l] + p["b2"][l]
        x = r + h
    return _layer_norm(x, p["lnf_g"], p["lnf_b"])


if __name__ == "__main__":
    key = jax.random.PRNGKey(0)
    pkey, tkey = jax.random.split(key)
    params = init_params(pkey)
    tokens = jax.random.randint(tkey, (B, S), 0, VOCAB, dtype=jnp.int32)

    out = jax.block_until_ready(clip_forward(tokens, params))

    ref = clip_ref(tokens, params)
    err = float(jnp.max(jnp.abs(out - ref)))
    assert out.shape == (B, S, D) and out.dtype == jnp.float32
    assert err < 5e-2, f"max abs error {err}"
    print("KERNEL_OK")
</pallas_src>

<mosaic_0001>
module attributes {stable_mosaic.version = 11 : i64} {
  func.func @clip_kernel(%arg0: i32, %arg1: memref<16x64xf32, #tpu.memory_space<vmem>>, %arg2: memref<1x64x192xbf16, #tpu.memory_space<vmem>>, %arg3: memref<1x1x192xf32, #tpu.memory_space<vmem>>, %arg4: memref<1x64x64xbf16, #tpu.memory_space<vmem>>, %arg5: memref<1x1x64xf32, #tpu.memory_space<vmem>>, %arg6: memref<1x1x64xf32, #tpu.memory_space<vmem>>, %arg7: memref<1x1x64xf32, #tpu.memory_space<vmem>>, %arg8: memref<1x1x64xf32, #tpu.memory_space<vmem>>, %arg9: memref<1x1x64xf32, #tpu.memory_space<vmem>>, %arg10: memref<1x64x256xbf16, #tpu.memory_space<vmem>>, %arg11: memref<1x1x256xf32, #tpu.memory_space<vmem>>, %arg12: memref<1x256x64xbf16, #tpu.memory_space<vmem>>, %arg13: memref<1x1x64xf32, #tpu.memory_space<vmem>>, %arg14: memref<1x64xf32, #tpu.memory_space<vmem>>, %arg15: memref<1x64xf32, #tpu.memory_space<vmem>>, %arg16: memref<16x64xf32, #tpu.memory_space<vmem>>, %arg17: memref<16x64xf32, #tpu.memory_space<vmem>>) attributes {dimension_semantics = [#tpu.dimension_semantics<arbitrary>], iteration_bounds = array<i64: 2>, scalar_prefetch = 0 : i64, scratch_operands = 1 : i64, tpu.core_type = #tpu.core_type<tc>, window_params = [{pipeline_mode = #tpu.pipeline_mode<synchronous>, transform_indices = @transform_0, window_bounds = array<i64: 16, 64>}, {transform_indices = @transform_1, window_bounds = array<i64: 1, 64, 192>}, {transform_indices = @transform_2, window_bounds = array<i64: 1, 1, 192>}, {transform_indices = @transform_3, window_bounds = array<i64: 1, 64, 64>}, {transform_indices = @transform_4, window_bounds = array<i64: 1, 1, 64>}, {transform_indices = @transform_5, window_bounds = array<i64: 1, 1, 64>}, {transform_indices = @transform_6, window_bounds = array<i64: 1, 1, 64>}, {transform_indices = @transform_7, window_bounds = array<i64: 1, 1, 64>}, {transform_indices = @transform_8, window_bounds = array<i64: 1, 1, 64>}, {transform_indices = @transform_9, window_bounds = array<i64: 1, 64, 256>}, {transform_indices = @transform_10, window_bounds = array<i64: 1, 1, 256>}, {transform_indices = @transform_11, window_bounds = array<i64: 1, 256, 64>}, {transform_indices = @transform_12, window_bounds = array<i64: 1, 1, 64>}, {pipeline_mode = #tpu.pipeline_mode<synchronous>, transform_indices = @transform_13, window_bounds = array<i64: 1, 64>}, {pipeline_mode = #tpu.pipeline_mode<synchronous>, transform_indices = @transform_14, window_bounds = array<i64: 1, 64>}, {pipeline_mode = #tpu.pipeline_mode<synchronous>, transform_indices = @transform_15, window_bounds = array<i64: 16, 64>}]} {
    %c0_i32 = arith.constant 0 : i32
    %0 = arith.cmpi eq, %arg0, %c0_i32 : i32
    %1 = arith.extui %0 : i1 to i32
    %c0_i32_0 = arith.constant 0 : i32
    %2 = arith.cmpi ne, %1, %c0_i32_0 : i32
    scf.if %2 {
      %c0_61 = arith.constant 0 : index
      %c0_62 = arith.constant 0 : index
      %161 = vector.load %arg1[%c0_61, %c0_62] : memref<16x64xf32, #tpu.memory_space<vmem>>, vector<16x64xf32>
      %c0_63 = arith.constant 0 : index
      %c0_64 = arith.constant 0 : index
      %162 = vector.load %arg17[%c0_63, %c0_64] : memref<16x64xf32, #tpu.memory_space<vmem>>, vector<16x64xf32>
      tpu.vector_store %arg17[%c0_63, %c0_64], %161 {strides = array<i32>} : memref<16x64xf32, #tpu.memory_space<vmem>>, vector<16x64xf32>,
    } else {
    }
    %c0 = arith.constant 0 : index
    %c0_1 = arith.constant 0 : index
    %3 = vector.load %arg17[%c0, %c0_1] : memref<16x64xf32, #tpu.memory_space<vmem>>, vector<16x64xf32>
    %4 = tpu.iota {dimensions = array<i32: 1>} : vector<1x8x8xi32>
    %5 = tpu.iota {dimensions = array<i32: 2>} : vector<1x8x8xi32>
    %6 = arith.cmpi sle, %5, %4 : vector<1x8x8xi32>
    %c0_2 = arith.constant 0 : index
    %c0_3 = arith.constant 0 : index
    %c0_4 = arith.constant 0 : index
    %7 = vector.load %arg6[%c0_2, %c0_3, %c0_4] : memref<1x1x64xf32, #tpu.memory_space<vmem>>, vector<1x1x64xf32>
    %8 = vector.shape_cast %7 : vector<1x1x64xf32> to vector<1x64xf32>
    %c0_5 = arith.constant 0 : index
    %c0_6 = arith.constant 0 : index
    %c0_7 = arith.constant 0 : index
    %9 = vector.load %arg7[%c0_5, %c0_6, %c0_7] : memref<1x1x64xf32, #tpu.memory_space<vmem>>, vector<1x1x64xf32>
    %10 = vector.shape_cast %9 : vector<1x1x64xf32> to vector<1x64xf32>
    %cst = arith.constant dense<0.000000e+00> : vector<16xf32>
    %11 = vector.multi_reduction <add>, %3, %cst [1] : vector<16x64xf32> to vector<16xf32>
    %12 = vector.shape_cast %11 : vector<16xf32> to vector<16x1xf32>
    %cst_8 = arith.constant 6.400000e+01 : f32
    %13 = vector.broadcast %cst_8 : f32 to vector<16x1xf32>
    %14 = arith.divf %12, %13 : vector<16x1xf32>
    %15 = vector.broadcast %14 : vector<16x1xf32> to vector<16x64xf32>
    %16 = arith.subf %3, %15 : vector<16x64xf32>
    %17 = arith.mulf %16, %16 : vector<16x64xf32>
    %cst_9 = arith.constant dense<0.000000e+00> : vector<16xf32>
    %18 = vector.multi_reduction <add>, %17, %cst_9 [1] : vector<16x64xf32> to vector<16xf32>
    %19 = vector.shape_cast %18 : vector<16xf32> to vector<16x1xf32>
    %cst_10 = arith.constant 6.400000e+01 : f32
    %20 = vector.broadcast %cst_10 : f32 to vector<16x1xf32>
    %21 = arith.divf %19, %20 : vector<16x1xf32>
    %22 = vector.broadcast %14 : vector<16x1xf32> to vector<16x64xf32>
    %23 = arith.subf %3, %22 : vector<16x64xf32>
    %cst_11 = arith.constant 9.99999974E-6 : f32
    %24 = vector.broadcast %cst_11 : f32 to vector<16x1xf32>
    %25 = arith.addf %21, %24 : vector<16x1xf32>
    %26 = math.rsqrt %25 : vector<16x1xf32>
    %27 = vector.broadcast %26 : vector<16x1xf32> to vector<16x64xf32>
    %28 = arith.mulf %23, %27 : vector<16x64xf32>
    %29 = vector.broadcast %8 : vector<1x64xf32> to vector<16x64xf32>
    %30 = arith.mulf %28, %29 : vector<16x64xf32>
    %31 = vector.broadcast %10 : vector<1x64xf32> to vector<16x64xf32>
    %32 = arith.addf %30, %31 : vector<16x64xf32>
    %33 = arith.truncf %32 : vector<16x64xf32> to vector<16x64xbf16>
    %c0_12 = arith.constant 0 : index
    %c0_13 = arith.constant 0 : index
    %c0_14 = arith.constant 0 : index
    %34 = vector.load %arg2[%c0_12, %c0_13, %c0_14] : memref<1x64x192xbf16, #tpu.memory_space<vmem>>, vector<1x64x192xbf16>
    %35 = vector.shape_cast %34 : vector<1x64x192xbf16> to vector<64x192xbf16>
    %cst_15 = arith.constant dense<0.000000e+00> : vector<16x192xf32>
    %36 = tpu.matmul %33, %35, %cst_15 {dimension_numbers = #tpu.dot_dimension_numbers<[1], [0], [0], [1], [0, 0, 1, 1], [], []>} : vector<16x64xbf16>, vector<64x192xbf16>, vector<16x192xf32> -> vector<16x192xf32>
    %c0_16 = arith.constant 0 : index
    %c0_17 = arith.constant 0 : index
    %c0_18 = arith.constant 0 : index
    %37 = vector.load %arg3[%c0_16, %c0_17, %c0_18] : memref<1x1x192xf32, #tpu.memory_space<vmem>>, vector<1x1x192xf32>
    %38 = vector.shape_cast %37 : vector<1x1x192xf32> to vector<1x192xf32>
    %39 = vector.broadcast %38 : vector<1x192xf32> to vector<16x192xf32>
    %40 = arith.addf %36, %39 : vector<16x192xf32>
    %41 = vector.extract_strided_slice %40 {offsets = [0, 0], sizes = [16, 16], strides = [1, 1]} : vector<16x192xf32> to vector<16x16xf32>
    %42 = vector.shape_cast %41 : vector<16x16xf32> to vector<2x8x16xf32>
    %43 = vector.extract_strided_slice %40 {offsets = [0, 16], sizes = [16, 16], strides = [1, 1]} : vector<16x192xf32> to vector<16x16xf32>
    %44 = vector.shape_cast %43 : vector<16x16xf32> to vector<2x8x16xf32>
    %45 = vector.extract_strided_slice %40 {offsets = [0, 32], sizes = [16, 16], strides = [1, 1]} : vector<16x192xf32> to vector<16x16xf32>
    %46 = vector.shape_cast %45 : vector<16x16xf32> to vector<2x8x16xf32>
    %47 = vector.extract_strided_slice %40 {offsets = [0, 48], sizes = [16, 16], strides = [1, 1]} : vector<16x192xf32> to vector<16x16xf32>
    %48 = vector.shape_cast %47 : vector<16x16xf32> to vector<2x8x16xf32>
    %49 = tpu.concatenate %42, %44, %46, %48 in 0 : vector<2x8x16xf32>, vector<2x8x16xf32>, vector<2x8x16xf32>, vector<2x8x16xf32> -> vector<8x8x16xf32>
    %50 = arith.truncf %49 : vector<8x8x16xf32> to vector<8x8x16xbf16>
    %51 = vector.extract_strided_slice %40 {offsets = [0, 64], sizes = [16, 16], strides = [1, 1]} : vector<16x192xf32> to vector<16x16xf32>
    %52 = vector.shape_cast %51 : vector<16x16xf32> to vector<2x8x16xf32>
    %53 = vector.extract_strided_slice %40 {offsets = [0, 80], sizes = [16, 16], strides = [1, 1]} : vector<16x192xf32> to vector<16x16xf32>
    %54 = vector.shape_cast %53 : vector<16x16xf32> to vector<2x8x16xf32>
    %55 = vector.extract_strided_slice %40 {offsets = [0, 96], sizes = [16, 16], strides = [1, 1]} : vector<16x192xf32> to vector<16x16xf32>
    %56 = vector.shape_cast %55 : vector<16x16xf32> to vector<2x8x16xf32>
    %57 = vector.extract_strided_slice %40 {offsets = [0, 112], sizes = [16, 16], strides = [1, 1]} : vector<16x192xf32> to vector<16x16xf32>
    %58 = vector.shape_cast %57 : vector<16x16xf32> to vector<2x8x16xf32>
    %59 = tpu.concatenate %52, %54, %56, %58 in 0 : vector<2x8x16xf32>, vector<2x8x16xf32>, vector<2x8x16xf32>, vector<2x8x16xf32> -> vector<8x8x16xf32>
    %60 = arith.truncf %59 : vector<8x8x16xf32> to vector<8x8x16xbf16>
    %61 = vector.extract_strided_slice %40 {offsets = [0, 128], sizes = [16, 16], strides = [1, 1]} : vector<16x192xf32> to vector<16x16xf32>
    %62 = vector.shape_cast %61 : vector<16x16xf32> to vector<2x8x16xf32>
    %63 = vector.extract_strided_slice %40 {offsets = [0, 144], sizes = [16, 16], strides = [1, 1]} : vector<16x192xf32> to vector<16x16xf32>
    %64 = vector.shape_cast %63 : vector<16x16xf32> to vector<2x8x16xf32>
    %65 = vector.extract_strided_slice %40 {offsets = [0, 160], sizes = [16, 16], strides = [1, 1]} : vector<16x192xf32> to vector<16x16xf32>
    %66 = vector.shape_cast %65 : vector<16x16xf32> to vector<2x8x16xf32>
    %67 = vector.extract_strided_slice %40 {offsets = [0, 176], sizes = [16, 16], strides = [1, 1]} : vector<16x192xf32> to vector<16x16xf32>
    %68 = vector.shape_cast %67 : vector<16x16xf32> to vector<2x8x16xf32>
    %69 = tpu.concatenate %62, %64, %66, %68 in 0 : vector<2x8x16xf32>, vector<2x8x16xf32>, vector<2x8x16xf32>, vector<2x8x16xf32> -> vector<8x8x16xf32>
    %70 = arith.truncf %69 : vector<8x8x16xf32> to vector<8x8x16xbf16>
    "tpu.trace_start"() <{level = 10 : i32, message = "nqd,nkd->nqk"}> : () -> ()
    %cst_19 = arith.constant dense<0.000000e+00> : vector<8x8x8xf32>
    %71 = tpu.matmul %50, %60, %cst_19 {dimension_numbers = #tpu.dot_dimension_numbers<[2], [2], [1], [1], [0, 0, 0, 1, 1, 1], [0], [0]>} : vector<8x8x16xbf16>, vector<8x8x16xbf16>, vector<8x8x8xf32> -> vector<8x8x8xf32>
    %cst_20 = arith.constant -1.000000e+30 : f32
    "tpu.trace_stop"() : () -> ()
    %72 = vector.shape_cast %6 : vector<1x8x8xi1> to vector<1x8x8xi1>
    %73 = vector.broadcast %72 : vector<1x8x8xi1> to vector<8x8x8xi1>
    %74 = vector.broadcast %cst_20 : f32 to vector<8x8x8xf32>
    %75 = arith.select %73, %71, %74 : vector<8x8x8xi1>, vector<8x8x8xf32>
    %cst_21 = arith.constant dense<0xFF800000> : vector<8x8xf32>
    %76 = vector.multi_reduction <maximumf>, %75, %cst_21 [2] : vector<8x8x8xf32> to vector<8x8xf32>
    %77 = vector.shape_cast %76 : vector<8x8xf32> to vector<8x8x1xf32>
    %78 = vector.broadcast %77 : vector<8x8x1xf32> to vector<8x8x8xf32>
    %79 = arith.subf %75, %78 : vector<8x8x8xf32>
    %80 = math.exp %79 : vector<8x8x8xf32>
    %cst_22 = arith.constant dense<0.000000e+00> : vector<8x8xf32>
    %81 = vector.multi_reduction <add>, %80, %cst_22 [2] : vector<8x8x8xf32> to vector<8x8xf32>
    %82 = vector.shape_cast %81 : vector<8x8xf32> to vector<8x8x1xf32>
    %83 = tpu.reciprocal %82 {approx = true} : vector<8x8x1xf32> -> vector<8x8x1xf32>
    %84 = vector.broadcast %83 : vector<8x8x1xf32> to vector<8x8x8xf32>
    %85 = arith.mulf %80, %84 : vector<8x8x8xf32>
    %86 = arith.truncf %85 : vector<8x8x8xf32> to vector<8x8x8xbf16>
    "tpu.trace_start"() <{level = 10 : i32, message = "nqk,nkd->nqd"}> : () -> ()
    %cst_23 = arith.constant dense<0.000000e+00> : vector<8x8x16xf32>
    %87 = tpu.matmul %86, %70, %cst_23 {dimension_numbers = #tpu.dot_dimension_numbers<[2], [1], [1], [2], [0, 0, 0, 1, 1, 2], [0], [0]>} : vector<8x8x8xbf16>, vector<8x8x16xbf16>, vector<8x8x16xf32> -> vector<8x8x16xf32>
    "tpu.trace_stop"() : () -> ()
    %88 = vector.extract_strided_slice %87 {offsets = [0, 0, 0], sizes = [2, 8, 16], strides = [1, 1, 1]} : vector<8x8x16xf32> to vector<2x8x16xf32>
    %89 = vector.shape_cast %88 : vector<2x8x16xf32> to vector<16x16xf32>
    %90 = vector.extract_strided_slice %87 {offsets = [2, 0, 0], sizes = [2, 8, 16], strides = [1, 1, 1]} : vector<8x8x16xf32> to vector<2x8x16xf32>
    %91 = vector.shape_cast %90 : vector<2x8x16xf32> to vector<16x16xf32>
    %92 = vector.extract_strided_slice %87 {offsets = [4, 0, 0], sizes = [2, 8, 16], strides = [1, 1, 1]} : vector<8x8x16xf32> to vector<2x8x16xf32>
    %93 = vector.shape_cast %92 : vector<2x8x16xf32> to vector<16x16xf32>
    %94 = vector.extract_strided_slice %87 {offsets = [6, 0, 0], sizes = [2, 8, 16], strides = [1, 1, 1]} : vector<8x8x16xf32> to vector<2x8x16xf32>
    %95 = vector.shape_cast %94 : vector<2x8x16xf32> to vector<16x16xf32>
    %96 = tpu.concatenate %89, %91, %93, %95 in 1 : vector<16x16xf32>, vector<16x16xf32>, vector<16x16xf32>, vector<16x16xf32> -> vector<16x64xf32>
    %97 = arith.truncf %96 : vector<16x64xf32> to vector<16x64xbf16>
    %c0_24 = arith.constant 0 : index
    %c0_25 = arith.constant 0 : index
    %c0_26 = arith.constant 0 : index
    %98 = vector.load %arg4[%c0_24, %c0_25, %c0_26] : memref<1x64x64xbf16, #tpu.memory_space<vmem>>, vector<1x64x64xbf16>
    %99 = vector.shape_cast %98 : vector<1x64x64xbf16> to vector<64x64xbf16>
    %cst_27 = arith.constant dense<0.000000e+00> : vector<16x64xf32>
    %100 = tpu.matmul %97, %99, %cst_27 {dimension_numbers = #tpu.dot_dimension_numbers<[1], [0], [0], [1], [0, 0, 1, 1], [], []>} : vector<16x64xbf16>, vector<64x64xbf16>, vector<16x64xf32> -> vector<16x64xf32>
    %c0_28 = arith.constant 0 : index
    %c0_29 = arith.constant 0 : index
    %c0_30 = arith.constant 0 : index
    %101 = vector.load %arg5[%c0_28, %c0_29, %c0_30] : memref<1x1x64xf32, #tpu.memory_space<vmem>>, vector<1x1x64xf32>
    %102 = vector.shape_cast %101 : vector<1x1x64xf32> to vector<1x64xf32>
    %103 = vector.broadcast %102 : vector<1x64xf32> to vector<16x64xf32>
    %104 = arith.addf %100, %103 : vector<16x64xf32>
    %105 = arith.addf %3, %104 : vector<16x64xf32>
    %c0_31 = arith.constant 0 : index
    %c0_32 = arith.constant 0 : index
    %c0_33 = arith.constant 0 : index
    %106 = vector.load %arg8[%c0_31, %c0_32, %c0_33] : memref<1x1x64xf32, #tpu.memory_space<vmem>>, vector<1x1x64xf32>
    %107 = vector.shape_cast %106 : vector<1x1x64xf32> to vector<1x64xf32>
    %c0_34 = arith.constant 0 : index
    %c0_35 = arith.constant 0 : index
    %c0_36 = arith.constant 0 : index
    %108 = vector.load %arg9[%c0_34, %c0_35, %c0_36] : memref<1x1x64xf32, #tpu.memory_space<vmem>>, vector<1x1x64xf32>
    %109 = vector.shape_cast %108 : vector<1x1x64xf32> to vector<1x64xf32>
    %cst_37 = arith.constant dense<0.000000e+00> : vector<16xf32>
    %110 = vector.multi_reduction <add>, %105, %cst_37 [1] : vector<16x64xf32> to vector<16xf32>
    %111 = vector.shape_cast %110 : vector<16xf32> to vector<16x1xf32>
    %cst_38 = arith.constant 6.400000e+01 : f32
    %112 = vector.broadcast %cst_38 : f32 to vector<16x1xf32>
    %113 = arith.divf %111, %112 : vector<16x1xf32>
    %114 = vector.broadcast %113 : vector<16x1xf32> to vector<16x64xf32>
    %115 = arith.subf %105, %114 : vector<16x64xf32>
    %116 = arith.mulf %115, %115 : vector<16x64xf32>
    %cst_39 = arith.constant dense<0.000000e+00> : vector<16xf32>
    %117 = vector.multi_reduction <add>, %116, %cst_39 [1] : vector<16x64xf32> to vector<16xf32>
    %118 = vector.shape_cast %117 : vector<16xf32> to vector<16x1xf32>
    %cst_40 = arith.constant 6.400000e+01 : f32
    %119 = vector.broadcast %cst_40 : f32 to vector<16x1xf32>
    %120 = arith.divf %118, %119 : vector<16x1xf32>
    %121 = vector.broadcast %113 : vector<16x1xf32> to vector<16x64xf32>
    %122 = arith.subf %105, %121 : vector<16x64xf32>
    %cst_41 = arith.constant 9.99999974E-6 : f32
    %123 = vector.broadcast %cst_41 : f32 to vector<16x1xf32>
    %124 = arith.addf %120, %123 : vector<16x1xf32>
    %125 = math.rsqrt %124 : vector<16x1xf32>
    %126 = vector.broadcast %125 : vector<16x1xf32> to vector<16x64xf32>
    %127 = arith.mulf %122, %126 : vector<16x64xf32>
    %128 = vector.broadcast %107 : vector<1x64xf32> to vector<16x64xf32>
    %129 = arith.mulf %127, %128 : vector<16x64xf32>
    %130 = vector.broadcast %109 : vector<1x64xf32> to vector<16x64xf32>
    %131 = arith.addf %129, %130 : vector<16x64xf32>
    %132 = arith.truncf %131 : vector<16x64xf32> to vector<16x64xbf16>
    %c0_42 = arith.constant 0 : index
    %c0_43 = arith.constant 0 : index
    %c0_44 = arith.constant 0 : index
    %133 = vector.load %arg10[%c0_42, %c0_43, %c0_44] : memref<1x64x256xbf16, #tpu.memory_space<vmem>>, vector<1x64x256xbf16>
    %134 = vector.shape_cast %133 : vector<1x64x256xbf16> to vector<64x256xbf16>
    %cst_45 = arith.constant dense<0.000000e+00> : vector<16x256xf32>
    %135 = tpu.matmul %132, %134, %cst_45 {dimension_numbers = #tpu.dot_dimension_numbers<[1], [0], [0], [1], [0, 0, 1, 1], [], []>} : vector<16x64xbf16>, vector<64x256xbf16>, vector<16x256xf32> -> vector<16x256xf32>
    %c0_46 = arith.constant 0 : index
    %c0_47 = arith.constant 0 : index
    %c0_48 = arith.constant 0 : index
    %136 = vector.load %arg11[%c0_46, %c0_47, %c0_48] : memref<1x1x256xf32, #tpu.memory_space<vmem>>, vector<1x1x256xf32>
    %137 = vector.shape_cast %136 : vector<1x1x256xf32> to vector<1x256xf32>
    %138 = vector.broadcast %137 : vector<1x256xf32> to vector<16x256xf32>
    %139 = arith.addf %135, %138 : vector<16x256xf32>
    %cst_49 = arith.constant 1.702000e+00 : f32
    %140 = vector.broadcast %cst_49 : f32 to vector<16x256xf32>
    %141 = arith.mulf %140, %139 : vector<16x256xf32>
    %142 = arith.negf %141 : vector<16x256xf32>
    %143 = math.exp %142 : vector<16x256xf32>
    %cst_50 = arith.constant 1.000000e+00 : f32
    %144 = vector.broadcast %cst_50 : f32 to vector<16x256xf32>
    %145 = arith.addf %144, %143 : vector<16x256xf32>
    %146 = arith.divf %144, %145 : vector<16x256xf32>
    %147 = arith.mulf %139, %146 : vector<16x256xf32>
    %148 = arith.truncf %147 : vector<16x256xf32> to vector<16x256xbf16>
    %c0_51 = arith.constant 0 : index
    %c0_52 = arith.constant 0 : index
    %c0_53 = arith.constant 0 : index
    %149 = vector.load %arg12[%c0_51, %c0_52, %c0_53] : memref<1x256x64xbf16, #tpu.memory_space<vmem>>, vector<1x256x64xbf16>
    %150 = vector.shape_cast %149 : vector<1x256x64xbf16> to vector<256x64xbf16>
    %cst_54 = arith.constant dense<0.000000e+00> : vector<16x64xf32>
    %151 = tpu.matmul %148, %150, %cst_54 {dimension_numbers = #tpu.dot_dimension_numbers<[1], [0], [0], [1], [0, 0, 1, 1], [], []>} : vector<16x256xbf16>, vector<256x64xbf16>, vector<16x64xf32> -> vector<16x64xf32>
    %152 = arith.addf %105, %151 : vector<16x64xf32>
    %c0_55 = arith.constant 0 : index
    %c0_56 = arith.constant 0 : index
    %c0_57 = arith.constant 0 : index
    %153 = vector.load %arg13[%c0_55, %c0_56, %c0_57] : memref<1x1x64xf32, #tpu.memory_space<vmem>>, vector<1x1x64xf32>
    %154 = vector.shape_cast %153 : vector<1x1x64xf32> to vector<1x64xf32>
    %155 = vector.broadcast %154 : vector<1x64xf32> to vector<16x64xf32>
    %156 = arith.addf %152, %155 : vector<16x64xf32>
    %c0_58 = arith.constant 0 : index
    %c0_59 = arith.constant 0 : index
    %157 = vector.load %arg17[%c0_58, %c0_59] : memref<16x64xf32, #tpu.memory_space<vmem>>, vector<16x64xf32>
    tpu.vector_store %arg17[%c0_58, %c0_59], %156 {strides = array<i32>} : memref<16x64xf32, #tpu.memory_space<vmem>>, vector<16x64xf32>,
    %c1_i32 = arith.constant 1 : i32
    %158 = arith.cmpi eq, %arg0, %c1_i32 : i32
    %159 = arith.extui %158 : i1 to i32
    %c0_i32_60 = arith.constant 0 : i32
    %160 = arith.cmpi ne, %159, %c0_i32_60 : i32
    scf.if %160 {
      %c0_61 = arith.constant 0 : index
      %c0_62 = arith.constant 0 : index
      %161 = vector.load %arg14[%c0_61, %c0_62] : memref<1x64xf32, #tpu.memory_space<vmem>>, vector<1x64xf32>
      %c0_63 = arith.constant 0 : index
      %c0_64 = arith.constant 0 : index
      %162 = vector.load %arg15[%c0_63, %c0_64] : memref<1x64xf32, #tpu.memory_space<vmem>>, vector<1x64xf32>
      %cst_65 = arith.constant dense<0.000000e+00> : vector<16xf32>
      %163 = vector.multi_reduction <add>, %156, %cst_65 [1] : vector<16x64xf32> to vector<16xf32>
      %164 = vector.shape_cast %163 : vector<16xf32> to vector<16x1xf32>
      %cst_66 = arith.constant 6.400000e+01 : f32
      %165 = vector.broadcast %cst_66 : f32 to vector<16x1xf32>
      %166 = arith.divf %164, %165 : vector<16x1xf32>
      %167 = vector.broadcast %166 : vector<16x1xf32> to vector<16x64xf32>
      %168 = arith.subf %156, %167 : vector<16x64xf32>
      %169 = arith.mulf %168, %168 : vector<16x64xf32>
      %cst_67 = arith.constant dense<0.000000e+00> : vector<16xf32>
      %170 = vector.multi_reduction <add>, %169, %cst_67 [1] : vector<16x64xf32> to vector<16xf32>
      %171 = vector.shape_cast %170 : vector<16xf32> to vector<16x1xf32>
      %cst_68 = arith.constant 6.400000e+01 : f32
      %172 = vector.broadcast %cst_68 : f32 to vector<16x1xf32>
      %173 = arith.divf %171, %172 : vector<16x1xf32>
      %174 = vector.broadcast %166 : vector<16x1xf32> to vector<16x64xf32>
      %175 = arith.subf %156, %174 : vector<16x64xf32>
      %cst_69 = arith.constant 9.99999974E-6 : f32
      %176 = vector.broadcast %cst_69 : f32 to vector<16x1xf32>
      %177 = arith.addf %173, %176 : vector<16x1xf32>
      %178 = math.rsqrt %177 : vector<16x1xf32>
      %179 = vector.broadcast %178 : vector<16x1xf32> to vector<16x64xf32>
      %180 = arith.mulf %175, %179 : vector<16x64xf32>
      %181 = vector.broadcast %161 : vector<1x64xf32> to vector<16x64xf32>
      %182 = arith.mulf %180, %181 : vector<16x64xf32>
      %183 = vector.broadcast %162 : vector<1x64xf32> to vector<16x64xf32>
      %184 = arith.addf %182, %183 : vector<16x64xf32>
      %c0_70 = arith.constant 0 : index
      %c0_71 = arith.constant 0 : index
      %185 = vector.load %arg16[%c0_70, %c0_71] : memref<16x64xf32, #tpu.memory_space<vmem>>, vector<16x64xf32>
      tpu.vector_store %arg16[%c0_70, %c0_71], %184 {strides = array<i32>} : memref<16x64xf32, #tpu.memory_space<vmem>>, vector<16x64xf32>,
    } else {
    }
    return
  }
  func.func @transform_0(%arg0: i32) -> (i32, i32) {
    %c0_i32 = arith.constant 0 : i32
    %c0_i32_0 = arith.constant 0 : i32
    %c0_i32_1 = arith.constant 0 : i32
    return %c0_i32, %c0_i32_0 : i32, i32
  }
  func.func @transform_1(%arg0: i32) -> (i32, i32, i32) {
    %c0_i32 = arith.constant 0 : i32
    %c0_i32_0 = arith.constant 0 : i32
    %c0_i32_1 = arith.constant 0 : i32
    return %arg0, %c0_i32, %c0_i32_0 : i32, i32, i32
  }
  func.func @transform_2(%arg0: i32) -> (i32, i32, i32) {
    %c0_i32 = arith.constant 0 : i32
    %c0_i32_0 = arith.constant 0 : i32
    %c0_i32_1 = arith.constant 0 : i32
    return %arg0, %c0_i32, %c0_i32_0 : i32, i32, i32
  }
  func.func @transform_3(%arg0: i32) -> (i32, i32, i32) {
    %c0_i32 = arith.constant 0 : i32
    %c0_i32_0 = arith.constant 0 : i32
    %c0_i32_1 = arith.constant 0 : i32
    return %arg0, %c0_i32, %c0_i32_0 : i32, i32, i32
  }
  func.func @transform_4(%arg0: i32) -> (i32, i32, i32) {
    %c0_i32 = arith.constant 0 : i32
    %c0_i32_0 = arith.constant 0 : i32
    %c0_i32_1 = arith.constant 0 : i32
    return %arg0, %c0_i32, %c0_i32_0 : i32, i32, i32
  }
  func.func @transform_5(%arg0: i32) -> (i32, i32, i32) {
    %c0_i32 = arith.constant 0 : i32
    %c0_i32_0 = arith.constant 0 : i32
    %c0_i32_1 = arith.constant 0 : i32
    return %arg0, %c0_i32, %c0_i32_0 : i32, i32, i32
  }
  func.func @transform_6(%arg0: i32) -> (i32, i32, i32) {
    %c0_i32 = arith.constant 0 : i32
    %c0_i32_0 = arith.constant 0 : i32
    %c0_i32_1 = arith.constant 0 : i32
    return %arg0, %c0_i32, %c0_i32_0 : i32, i32, i32
  }
  func.func @transform_7(%arg0: i32) -> (i32, i32, i32) {
    %c0_i32 = arith.constant 0 : i32
    %c0_i32_0 = arith.constant 0 : i32
    %c0_i32_1 = arith.constant 0 : i32
    return %arg0, %c0_i32, %c0_i32_0 : i32, i32, i32
  }
  func.func @transform_8(%arg0: i32) -> (i32, i32, i32) {
    %c0_i32 = arith.constant 0 : i32
    %c0_i32_0 = arith.constant 0 : i32
    %c0_i32_1 = arith.constant 0 : i32
    return %arg0, %c0_i32, %c0_i32_0 : i32, i32, i32
  }
  func.func @transform_9(%arg0: i32) -> (i32, i32, i32) {
    %c0_i32 = arith.constant 0 : i32
    %c0_i32_0 = arith.constant 0 : i32
    %c0_i32_1 = arith.constant 0 : i32
    return %arg0, %c0_i32, %c0_i32_0 : i32, i32, i32
  }
  func.func @transform_10(%arg0: i32) -> (i32, i32, i32) {
    %c0_i32 = arith.constant 0 : i32
    %c0_i32_0 = arith.constant 0 : i32
    %c0_i32_1 = arith.constant 0 : i32
    return %arg0, %c0_i32, %c0_i32_0 : i32, i32, i32
  }
  func.func @transform_11(%arg0: i32) -> (i32, i32, i32) {
    %c0_i32 = arith.constant 0 : i32
    %c0_i32_0 = arith.constant 0 : i32
    %c0_i32_1 = arith.constant 0 : i32
    return %arg0, %c0_i32, %c0_i32_0 : i32, i32, i32
  }
  func.func @transform_12(%arg0: i32) -> (i32, i32, i32) {
    %c0_i32 = arith.constant 0 : i32
    %c0_i32_0 = arith.constant 0 : i32
    %c0_i32_1 = arith.constant 0 : i32
    return %arg0, %c0_i32, %c0_i32_0 : i32, i32, i32
  }
  func.func @transform_13(%arg0: i32) -> (i32, i32) {
    %c0_i32 = arith.constant 0 : i32
    %c0_i32_0 = arith.constant 0 : i32
    %c0_i32_1 = arith.constant 0 : i32
    return %c0_i32, %c0_i32_0 : i32, i32
  }
  func.func @transform_14(%arg0: i32) -> (i32, i32) {
    %c0_i32 = arith.constant 0 : i32
    %c0_i32_0 = arith.constant 0 : i32
    %c0_i32_1 = arith.constant 0 : i32
    return %c0_i32, %c0_i32_0 : i32, i32
  }
  func.func @transform_15(%arg0: i32) -> (i32, i32) {
    %c0_i32 = arith.constant 0 : i32
    %c0_i32_0 = arith.constant 0 : i32
    %c0_i32_1 = arith.constant 0 : i32
    return %c0_i32, %c0_i32_0 : i32, i32
  }
}

</mosaic_0001>

<bundles_post_ra>
// kernel: tpu_custom_call.1
= control target key start
LH: loop header
LB: loop body
LE: loop exit
PB: predicated region body
PF: predicated region fallthrough
CT: control target
= control target key end

     0   :  { %s3409_s0 = inlined_call_operand.vmem [shape: f32[16,64], index: 0, kind: input, shape index: {}]   ;;  %s3410_s1 = inlined_call_operand.vmem [shape: bf16[2,64,192], index: 1, kind: input, shape index: {}]   ;;  %s3411_s2 = inlined_call_operand.vmem [shape: f32[2,1,192], index: 2, kind: input, shape index: {}]   ;;  %s3412_s3 = inlined_call_operand.vmem [shape: bf16[2,64,64], index: 3, kind: input, shape index: {}]   ;;  %s3413_s4 = inlined_call_operand.vmem [shape: f32[2,1,64], index: 4, kind: input, shape index: {}]   ;;  %s3414_s5 = inlined_call_operand.vmem [shape: f32[2,1,64], index: 5, kind: input, shape index: {}]   ;;  %s3415_s6 = inlined_call_operand.vmem [shape: f32[2,1,64], index: 6, kind: input, shape index: {}]   ;;  %s3416_s7 = inlined_call_operand.vmem [shape: f32[2,1,64], index: 7, kind: input, shape index: {}]   ;;  %s3417_s8 = inlined_call_operand.vmem [shape: f32[2,1,64], index: 8, kind: input, shape index: {}]   ;;  %s3418_s9 = inlined_call_operand.vmem [shape: bf16[2,64,256], index: 9, kind: input, shape index: {}]   ;;  %s3419_s10 = inlined_call_operand.vmem [shape: f32[2,1,256], index: 10, kind: input, shape index: {}]   ;;  %s3420_s11 = inlined_call_operand.vmem [shape: bf16[2,256,64], index: 11, kind: input, shape index: {}]   ;;  %s3421_s12 = inlined_call_operand.vmem [shape: f32[2,1,64], index: 12, kind: input, shape index: {}]   ;;  %s3422_s13 = inlined_call_operand.vmem [shape: f32[1,64], index: 13, kind: input, shape index: {}]   ;;  %s3423_s14 = inlined_call_operand.vmem [shape: f32[1,64], index: 14, kind: input, shape index: {}]   ;;  %s3424_s15 = inlined_call_operand.hbm [shape: f32[16,64], index: 15, kind: output, shape index: {}]  }
   0x1   :  { %3429 = sst [smem:[#allocation9_spill]] %s3409_s0 }
   0x2   :  { %3430 = sst [smem:[#allocation10_spill]] %s3410_s1 }
   0x3   :  { %3431 = sst [smem:[#allocation11_spill]] %s3411_s2 }
   0x4   :  { %3432 = sst [smem:[#allocation12_spill]] %s3422_s13 }
   0x5   :  { %3433 = sst [smem:[#allocation13_spill]] %s3423_s14 }
   0x6   :  { %3434 = sst [smem:[#allocation14_spill]] %s3424_s15 }
   0x7   :  { %20 = vsyncpa [#allocation4], 0  ;;  %s3018_s18 = smov 0  }
   0x8 LB: > { %3435 = sst [smem:[#allocation6_spill]] %s2923_s18  ;;  %s3024_s19 = sadd.s32 4294967295, %s2923_s18   ;;  %s2923_s18 = sphi %s3018_s18, %s26_s18  }
   0x9   : > { %p2454_p0 = scmp.ge.s32.totalorder %s2923_s18, 1  ;;  %p529_p1 = scmp.lt.s32.totalorder %s2923_s18, 3 }
   0xb   : > { %p530_p2 = pnand %p2454_p0, %p529_p1 }
   0xd   : > { %533 = sbr.rel (%p530_p2) target bundleno = 3056 (0xbf0), region = 80 }
  0x14   : > { %p613_p3 = scmp.lt.s32.totalorder %s3024_s19, 1  ;;  %s3436_s1 = sld [smem:[#allocation10_spill]] }
  0x15   : > { %s3438_s2 = sld [smem:[#allocation11_spill]]  ;;  %p2465_p4 = scmp.ne.s32.totalorder %s3024_s19, 0 }
  0x16   : > { %s3030_s20 = scalar_select %p613_p3, %s3024_s19, 1 }
  0x17   : > { %s3440_s30 = sld [smem:[#allocation9_spill]] (!%p2465_p4)  ;;  %vm666_vm0 = vcmask (!%p2465_p4), 523264  }
  0x18   : > { %s2538_s21 = sshll.u32 %s3030_s20, 6  ;;  %s2457_s22 = sshll.u32 %s3030_s20, 1 }
  0x19   : > { %s2539_s29 = sshll.u32 %s3030_s20, 5  ;;  %s632_s23 = scalar_lea.vmem %s3414_s5, %s3030_s20 }
  0x1a   : > { %s3037_s25 = scalar_lea.vmem %s3436_s1, %s2538_s21  ;;  %s3052_s14 = scalar_lea.vmem %s3412_s3, %s2539_s29 }
  0x1b   : > { %3437 = sst [smem:[#allocation7_spill]] %s3037_s25  ;;  %s3042_s28 = scalar_lea.vmem %s3438_s2, %s2457_s22 }
  0x1c   : > { %3439 = sst [smem:[#allocation8_spill]] %s3042_s28  ;;  %s641_s16 = scalar_lea.vmem %s3417_s8, %s3030_s20 }
  0x1d   : > { %s3073_s18 = scalar_lea.vmem %s3418_s9, %s2538_s21  ;;  %s3078_s13 = scalar_lea.vmem %s3419_s10, %s2457_s22  ;;  %v664_v0 = vld [vmem:[%s3440_s30] sm:$0xff] (!%p2465_p4)  ;;  %v665_v1 = vld [vmem:[%s3440_s30 + $0x8] sm:$0xff] (!%p2465_p4) }
  0x1e   : > { %s2541_s1 = sshll.u32 %s3030_s20, 7  ;;  %s658_s25 = scalar_lea.vmem %s3421_s12, %s3030_s20  ;;  %667 = vst.msk [vmem:[#allocation2] sm:$0xff] (!%p2465_p4), %vm666_vm0, %v664_v0  ;;  %668 = vst.msk [vmem:[#allocation2 + $0x8] sm:$0xff] (!%p2465_p4), %vm666_vm0, %v665_v1 }
  0x1f   : > { %s3084_s2 = scalar_lea.vmem %s3420_s11, %s2541_s1  ;;  %663 = sbr.rel (%p2465_p4) target bundleno = 38 (0x26), region = 84 }
  0x26 PF: > { %v669_v2 = vld [vmem:[#allocation2] sm:$0xff]  ;;  %vm678_vm1 = vcmask 523264   ;;  %v670_v3 = vld [vmem:[#allocation2 + $0x8] sm:$0xff]  ;;  %s3441_s28 = sld [smem:[#allocation7_spill]]  ;;  %v2925_v24 = vmov 0   ;;  %s3442_s26 = sld [smem:[#allocation8_spill]]  ;;  %v671_v42 = vlaneseq }
  0x27   : > { %v679_v4 = vsel %vm678_vm1, %v669_v2, 0.0  ;;  %v682_v5 = vsel %vm678_vm1, %v670_v3, 0.0  ;;  %818 = vmatprep.mubr.bf16.mxu1 %v2925_v24  ;;  %v2466_v33 = vld [vmem:[%s632_s23] ss:$0 sm:$0xff]  ;;  %s3443_s27 = scalar_lea.vmem %s3415_s6, %s3030_s20  ;;  %v2926_v52 = vmov 0.0   ;;  %s2927_s23 = smov 96  }
  0x28   : > { %680 = vadd.xlane.f32.xlu0 %v679_v4  ;;  %v2467_v37 = vld [vmem:[%s3443_s27] ss:$0 sm:$0xff]  ;;  %v3122_v43 = vshrl.u32 %v671_v42, 7  ;;  %2613 = vmatprep.subr.bf16.mxu0 %v2926_v52  ;;  %s2928_s21 = smov 112   ;;  %vm2929_vm2 = vmmov 0   ;;  %s2930_s17 = smov 80  }
  0x29   : > { %2615 = vmatprep.mubr.msk.bf16.mxu0 %vm2929_vm2, %v2926_v52  ;;  %s2931_s22 = smov 64   ;;  %vm888_vm3 = vcmask 130048   ;;  %vm1388_vm4 = vcmask 1043456   ;;  %vm1288_vm6 = vcmask 64512   ;;  %s2932_s15 = smov 16   ;;  %vm1780_vm7 = vcmask 261120  }
  0x2a   : > { %v735_v44 = vsub.s32 0, %v3122_v43  ;;  %v739_v46 = vsub.s32 1, %v3122_v43  ;;  %vm1783_vm8 = vcmask 392192   ;;  %s3446_s0 = scalar_lea.vmem %s3413_s4, %s3030_s20  ;;  %p2531_p5 = scmp.ne.s32.totalorder %s3024_s19, 1 }
  0x2c   : > { %683 = vadd.xlane.f32.xlu0 %v682_v5  ;;  %v2781_v16 = vld [vmem:[%s3441_s28 + $0x4] ss:$8 sps:$4 sm:$0xff]   ;;  %v2783_v17 = vld [vmem:[%s3441_s28] ss:$8 sps:$4 sm:$0xff]   ;;  %v2784_v18 = vld [vmem:[%s3441_s28 + $0x14] ss:$8 sps:$4 sm:$0xff]  }
  0x2d   : > { %786 = vmatprep.subr.bf16.mxu1 %v2781_v16  ;;  %v2786_v19 = vld [vmem:[%s3441_s28 + $0x10] ss:$8 sps:$4 sm:$0xff]   ;;  %v2787_v20 = vld [vmem:[%s3441_s28 + $0x24] ss:$8 sps:$4 sm:$0xff]   ;;  %v2789_v21 = vld [vmem:[%s3441_s28 + $0x20] ss:$8 sps:$4 sm:$0xff]  }
  0x2e   : > { %787 = vmatpush1.bf16.msra.mxu1 %v2783_v17  ;;  %v2790_v22 = vld [vmem:[%s3441_s28 + $0x34] ss:$8 sps:$4 sm:$0xff]   ;;  %v2792_v23 = vld [vmem:[%s3441_s28 + $0x30] ss:$8 sps:$4 sm:$0xff]   ;;  %v731_v45 = vld [vmem:[%s3442_s26] sm:$0x3] }
  0x2f   : > { %788 = vmatprep.subr.bf16.mxu1 %v2784_v18  ;;  %v736_v47 = vrot.slane %v731_v45, %v735_v44  ;;  %v740_v49 = vrot.slane %v731_v45, %v739_v46  ;;  %s2933_s28 = smov 32  }
  0x32   : > { %789 = vmatpush1.bf16.msra.mxu1 %v2786_v19 }
  0x33   : > { %790 = vmatprep.subr.bf16.mxu1 %v2787_v20 }
  0x36   : > { %791 = vmatpush1.bf16.msra.mxu1 %v2789_v21 }
  0x37   : > { %792 = vmatprep.subr.bf16.mxu1 %v2790_v22 }
  0x3a   : > { %793 = vmatpush1.bf16.msra.mxu1 %v2792_v23 }
  0x3b   : > { %2601 = vmatprep.subr.bf16.mxu1 %v2926_v52 }
  0xb5   : > { %v681_v6 = vpop.xlane.xlu0 %680 }
  0xb6   : > { %v686_v7 = vmul.f32 0.015625, %v681_v6 }
  0xb8   : > { %v688_v8 = vsub.f32 %v669_v2, %v686_v7 }
  0xb9   : > { %v684_v9 = vpop.xlane.xlu0 %683 }
  0xba   : > { %v687_v10 = vmul.f32 0.015625, %v684_v9  ;;  %v690_v11 = vmul.f32 %v688_v8, %v688_v8 }
  0xbc   : > { %v689_v12 = vsub.f32 %v670_v3, %v687_v10  ;;  %v692_v13 = vsel %vm678_vm1, %v690_v11, 0.0 }
  0xbd   : > { %693 = vadd.xlane.f32.xlu1 %v692_v13 }
  0xbe   : > { %v691_v14 = vmul.f32 %v689_v12, %v689_v12 }
  0xc0   : > { %v695_v15 = vsel %vm678_vm1, %v691_v14, 0.0 }
  0xc1   : > { %696 = vadd.xlane.f32.xlu1 %v695_v15 }
 0x14a   : > { %v694_v25 = vpop.xlane.xlu1 %693 }
 0x14b   : > { %v698_v26 = vmul.f32 0.015625, %v694_v25 }
 0x14d   : > { %v700_v27 = vadd.f32 1e-05, %v698_v26 }
 0x14e   : > { %v697_v28 = vpop.xlane.xlu1 %696 }
 0x14f   : > { %2825 = vrsqrt.f32 %v700_v27  ;;  %v699_v29 = vmul.f32 0.015625, %v697_v28 }
 0x151   : > { %v701_v30 = vadd.f32 1e-05, %v699_v29 }
 0x153   : > { %2827 = vrsqrt.f32 %v701_v30 }
 0x159   : > { %v2826_v31 = vpop.eup %2825 }
 0x15a   : > { %v704_v32 = vmul.f32 %v2826_v31, %v688_v8 }
 0x15c   : > { %v712_v36 = vmul.f32 %v2466_v33, %v704_v32 }
 0x15d   : > { %v2828_v34 = vpop.eup %2827 }
 0x15e   : > { %v705_v35 = vmul.f32 %v2828_v34, %v689_v12  ;;  %v720_v39 = vadd.f32 %v2467_v37, %v712_v36  ;;  %v674_v34 = vand.u32 127, %v671_v42 }
 0x160   : > { %v713_v38 = vmul.f32 %v2466_v33, %v705_v35  ;;  %vm3198_vm5 = vcmp.le.s32.totalorder %v674_v34, %v3122_v43 }
 0x162   : > { %v721_v40 = vadd.f32 %v2467_v37, %v713_v38 }
 0x164   : > { %v722_v41 = vpack.c.bf16 %v721_v40, %v720_v39 }
 0x166   : > { %2476 = vmatmul.mubr.msk.bf16.vlgmr.msra.gmra.mrb[0].mxu1 %vm678_vm1, %v722_v41 }
 0x167   : > { %2603 = vmatprep.mubr.msk.bf16.mxu1 %vm2929_vm2, %v2926_v52 }
 0x239   : > { %v820_v48 = vpop.f32.mrb[0].mxu1 }
 0x23a   : > { %v822_v50 = vpop.f32.mrb[1].mxu1  ;;  %v821_v53 = vadd.f32 %v820_v48, %v736_v47 }
 0x23b   : > { %v824_v51 = vpop.f32.mrb[2].mxu1  ;;  %v3133_v56 = vadd.f32 %v822_v50, %v740_v49 }
 0x23c   : > { %v825_v54 = vadd.f32 %v824_v51, %v736_v47  ;;  %v826_v55 = vpop.f32.mrb[3].mxu1  ;;  %v849_v61 = vpack.c.bf16 %v821_v53, %v821_v53 }
 0x23d   : > { %v3135_v57 = vadd.f32 %v826_v55, %v740_v49  ;;  %v877_v30 = vpack.c.bf16 %v3133_v56, %v3133_v56 }
 0x23e   : > { %v2741_v58 = vpack.i.bf16 %v825_v54, %v821_v53  ;;  %v850_v60 = vpack.c.bf16 %v825_v54, %v825_v54 }
 0x23f   : > { %v3139_v59 = vpack.i.bf16 %v3135_v57, %v3133_v56  ;;  %v878_v31 = vpack.c.bf16 %v3135_v57, %v3135_v57  ;;  %v1390_v32 = vsel %vm1388_vm4, %v877_v30, 0 }
 0x240   : > { %2742 = vrot.lane.b32.xlu1 %v2741_v58, %s2927_s23  ;;  %2737 = vrot.lane.b32.xlu0 %v2741_v58, %s2928_s21 }
 0x241   : > { %v1436_v33 = vsel %vm1388_vm4, %v878_v31, 0 }
 0x244   : > { %2747 = vrot.lane.b32.xlu1 %v2741_v58, %s2930_s17  ;;  %936 = vrot.lane.b32.xlu0 %v850_v60, %s2931_s22 }
 0x248   : > { %886 = vrot.lane.b32.xlu1 %v849_v61, %s2931_s22 }
 0x2b2   : > { %v2743_v62 = vpop.permute.xlu1 %2742  ;;  %v2738_v63 = vpop.permute.xlu0 %2737 }
 0x2b3   : > { %v2740_v0 = vunpack.i.h.bf16 %v2738_v63  ;;  %v2739_v1 = vunpack.i.l.bf16 %v2738_v63  ;;  %v2745_v2 = vunpack.i.h.bf16 %v2743_v62  ;;  %v2744_v3 = vunpack.i.l.bf16 %v2743_v62 }
 0x2b5   : > { %v852_v4 = vpack.c.bf16 %v2740_v0, %v2740_v0  ;;  %v851_v5 = vpack.c.bf16 %v2739_v1, %v2739_v1  ;;  %v854_v7 = vpack.c.bf16 %v2745_v2, %v2745_v2  ;;  %v853_v8 = vpack.c.bf16 %v2744_v3, %v2744_v3 }
 0x2b6   : > { %v2748_v6 = vpop.permute.xlu1 %2747  ;;  %v937_v15 = vpop.permute.xlu0 %936 }
 0x2b7   : > { %1034 = vrot.lane.b32.xlu0 %v852_v4, %s2931_s22  ;;  %985 = vrot.lane.b32.xlu1 %v851_v5, %s2931_s22  ;;  %v2750_v9 = vunpack.i.h.bf16 %v2748_v6  ;;  %v2749_v10 = vunpack.i.l.bf16 %v2748_v6  ;;  %v942_v16 = vsel %vm888_vm3, %v937_v15, 0 }
 0x2b9   : > { %v856_v13 = vpack.c.bf16 %v2750_v9, %v2750_v9  ;;  %v855_v14 = vpack.c.bf16 %v2749_v10, %v2749_v10 }
 0x2ba   : > { %v887_v11 = vpop.permute.xlu1 %886 }
 0x2bb   : > { %v893_v12 = vsel %vm888_vm3, %v887_v11, 0  ;;  %1132 = vrot.lane.b32.xlu0 %v854_v7, %s2931_s22  ;;  %1083 = vrot.lane.b32.xlu1 %v853_v8, %s2931_s22 }
 0x2bc   : > { %2602 = vmatpush3.bf16.xpose.msra.mxu1 %v893_v12 }
 0x2bd   : > { %2607 = vmatprep.subr.bf16.mxu1 %v2926_v52 }
 0x2bf   : > { %1230 = vrot.lane.b32.xlu0 %v856_v13, %s2931_s22  ;;  %1181 = vrot.lane.b32.xlu1 %v855_v14, %s2931_s22  ;;  %s3449_s22 = sld [smem:[#allocation13_spill]] (!%p2531_p5) }
 0x2c3   : > { %2604 = vmatmul.mubr.msk.bf16.vlgmr.msra.gmra.mrb[4].mxu1 %vm888_vm3, %v849_v61 }
 0x2c4   : > { %2608 = vmatpush3.bf16.xpose.msra.mxu1 %v942_v16  ;;  %2609 = vmatprep.mubr.msk.bf16.mxu1 %vm2929_vm2, %v2926_v52 }
 0x2c5   : > { %2619 = vmatprep.subr.bf16.mxu1 %v2926_v52 }
 0x2cb   : > { %2610 = vmatmul.mubr.msk.bf16.vlgmr.msra.gmra.mrb[8].mxu1 %vm888_vm3, %v850_v60 }
 0x2cc   : > { %2621 = vmatprep.mubr.msk.bf16.mxu1 %vm2929_vm2, %v2926_v52 }
 0x329   : > { %v1035_v17 = vpop.permute.xlu0 %1034  ;;  %v986_v18 = vpop.permute.xlu1 %985 }
 0x32a   : > { %v1040_v19 = vsel %vm888_vm3, %v1035_v17, 0  ;;  %v991_v20 = vsel %vm888_vm3, %v986_v18, 0 }
 0x32b   : > { %2614 = vmatpush3.bf16.xpose.msra.mxu0 %v991_v20  ;;  %2620 = vmatpush3.bf16.xpose.msra.mxu1 %v1040_v19 }
 0x32c   : > { %2625 = vmatprep.subr.bf16.mxu0 %v2926_v52  ;;  %2631 = vmatprep.subr.bf16.mxu1 %v2926_v52 }
 0x32d   : > { %v1133_v21 = vpop.permute.xlu0 %1132  ;;  %v1084_v22 = vpop.permute.xlu1 %1083 }
 0x32e   : > { %v1138_v23 = vsel %vm888_vm3, %v1133_v21, 0  ;;  %v1089_v25 = vsel %vm888_vm3, %v1084_v22, 0 }
 0x331   : > { %v1231_v26 = vpop.permute.xlu0 %1230  ;;  %v1182_v27 = vpop.permute.xlu1 %1181 }
 0x332   : > { %2616 = vmatmul.mubr.msk.bf16.vlgmr.msra.gmra.mrb[0].mxu0 %vm888_vm3, %v851_v5  ;;  %2622 = vmatmul.mubr.msk.bf16.vlgmr.msra.gmra.mrb[12].mxu1 %vm888_vm3, %v852_v4  ;;  %v1236_v28 = vsel %vm888_vm3, %v1231_v26, 0  ;;  %v1187_v29 = vsel %vm888_vm3, %v1182_v27, 0 }
 0x333   : > { %2626 = vmatpush3.bf16.xpose.msra.mxu0 %v1089_v25  ;;  %2632 = vmatpush3.bf16.xpose.msra.mxu1 %v1138_v23 }
 0x334   : > { %2627 = vmatprep.mubr.msk.bf16.mxu0 %vm2929_vm2, %v2926_v52  ;;  %2633 = vmatprep.mubr.msk.bf16.mxu1 %vm2929_vm2, %v2926_v52 }
 0x335   : > { %2637 = vmatprep.subr.bf16.mxu0 %v2926_v52  ;;  %2643 = vmatprep.subr.bf16.mxu1 %v2926_v52 }
 0x33a   : > { %2628 = vmatmul.mubr.msk.bf16.vlgmr.msra.gmra.mrb[4].mxu0 %vm888_vm3, %v853_v8  ;;  %2634 = vmatmul.mubr.msk.bf16.vlgmr.msra.gmra.mrb[16].mxu1 %vm888_vm3, %v854_v7 }
 0x33b   : > { %2638 = vmatpush3.bf16.xpose.msra.mxu0 %v1187_v29  ;;  %2644 = vmatpush3.bf16.xpose.msra.mxu1 %v1236_v28 }
 0x33c   : > { %2639 = vmatprep.mubr.msk.bf16.mxu0 %vm2929_vm2, %v2926_v52  ;;  %2645 = vmatprep.mubr.msk.bf16.mxu1 %vm2929_vm2, %v2926_v52 }
 0x33d   : > { %2649 = vmatprep.subr.bf16.mxu0 %v2926_v52  ;;  %2655 = vmatprep.subr.bf16.mxu1 %v2926_v52 }
 0x342   : > { %2640 = vmatmul.mubr.msk.bf16.vlgmr.msra.gmra.mrb[8].mxu0 %vm888_vm3, %v855_v14  ;;  %2646 = vmatmul.mubr.msk.bf16.vlgmr.msra.gmra.mrb[20].mxu1 %vm888_vm3, %v856_v13 }
 0x343   : > { %2650 = vmatpush3.bf16.msra.mxu0 %v1390_v32  ;;  %2656 = vmatpush3.bf16.msra.mxu1 %v1436_v33 }
 0x344   : > { %2657 = vmatprep.mubr.msk.bf16.mxu1 %vm2929_vm2, %v2926_v52  ;;  %2667 = vmatprep.subr.bf16.mxu1 %v2926_v52 }
 0x345   : > { %2651 = vmatprep.mubr.msk.bf16.mxu0 %vm2929_vm2, %v2926_v52  ;;  %2661 = vmatprep.subr.bf16.mxu0 %v2926_v52 }
 0x396   : > { %v929_v36 = vpop.f32.mrb[4].mxu1 }
 0x397   : > { %v1280_v37 = vsel %vm3198_vm5, %v929_v36, -1e+30  ;;  %v2605_v38 = vpop.f32.mrb[5].mxu1 }
 0x398   : > { %v932_v39 = vpop.f32.mrb[6].mxu1  ;;  %v1289_v40 = vsel %vm1288_vm6, %v1280_v37, -inf }
 0x399   : > { %1290 = vmax.xlane.f32.xlu1 %v1289_v40  ;;  %v2606_v41 = vpop.f32.mrb[7].mxu1 }
 0x39e   : > { %v978_v45 = vpop.f32.mrb[8].mxu1 }
 0x39f   : > { %v1281_v42 = vsel %vm3198_vm5, %v978_v45, -1e+30  ;;  %v2611_v47 = vpop.f32.mrb[9].mxu1 }
 0x3a0   : > { %v981_v48 = vpop.f32.mrb[10].mxu1  ;;  %v1292_v49 = vsel %vm1288_vm6, %v1281_v42, -inf }
 0x3a1   : > { %1293 = vmax.xlane.f32.xlu0 %v1292_v49  ;;  %v2612_v50 = vpop.f32.mrb[11].mxu1 }
 0x405   : > { %v1027_v51 = vpop.f32.mrb[0].mxu0  ;;  %v1076_v53 = vpop.f32.mrb[12].mxu1 }
 0x406   : > { %v1282_v54 = vsel %vm3198_vm5, %v1027_v51, -1e+30  ;;  %v2617_v55 = vpop.f32.mrb[1].mxu0  ;;  %v2623_v56 = vpop.f32.mrb[13].mxu1  ;;  %v1283_v61 = vsel %vm3198_vm5, %v1076_v53, -1e+30 }
 0x407   : > { %v1030_v57 = vpop.f32.mrb[2].mxu0  ;;  %v1079_v58 = vpop.f32.mrb[14].mxu1  ;;  %v1295_v60 = vsel %vm1288_vm6, %v1282_v54, -inf  ;;  %v1298_v0 = vsel %vm1288_vm6, %v1283_v61, -inf }
 0x408   : > { %v2624_v62 = vpop.f32.mrb[15].mxu1  ;;  %1296 = vmax.xlane.f32.xlu0 %v1295_v60  ;;  %v2618_v63 = vpop.f32.mrb[3].mxu0 }
 0x40c   : > { %1299 = vmax.xlane.f32.xlu0 %v1298_v0 }
 0x40d   : > { %v1125_v1 = vpop.f32.mrb[4].mxu0  ;;  %v1174_v2 = vpop.f32.mrb[16].mxu1 }
 0x40e   : > { %v1284_v3 = vsel %vm3198_vm5, %v1125_v1, -1e+30  ;;  %v1285_v4 = vsel %vm3198_vm5, %v1174_v2, -1e+30  ;;  %v2629_v5 = vpop.f32.mrb[5].mxu0  ;;  %v2635_v6 = vpop.f32.mrb[17].mxu1 }
 0x40f   : > { %v1128_v7 = vpop.f32.mrb[6].mxu0  ;;  %v1177_v8 = vpop.f32.mrb[18].mxu1  ;;  %v1304_v9 = vsel %vm1288_vm6, %v1285_v4, -inf  ;;  %v1301_v10 = vsel %vm1288_vm6, %v1284_v3, -inf }
 0x410   : > { %v2636_v11 = vpop.f32.mrb[19].mxu1  ;;  %1305 = vmax.xlane.f32.xlu0 %v1304_v9  ;;  %1302 = vmax.xlane.f32.xlu1 %v1301_v10  ;;  %v2630_v12 = vpop.f32.mrb[7].mxu0 }
 0x415   : > { %v1223_v13 = vpop.f32.mrb[8].mxu0  ;;  %v1272_v14 = vpop.f32.mrb[20].mxu1 }
 0x416   : > { %v1286_v15 = vsel %vm3198_vm5, %v1223_v13, -1e+30  ;;  %v1287_v16 = vsel %vm3198_vm5, %v1272_v14, -1e+30  ;;  %v2641_v17 = vpop.f32.mrb[9].mxu0  ;;  %v2647_v18 = vpop.f32.mrb[21].mxu1 }
 0x417   : > { %v1226_v19 = vpop.f32.mrb[10].mxu0  ;;  %v1275_v20 = vpop.f32.mrb[22].mxu1  ;;  %v1310_v21 = vsel %vm1288_vm6, %v1287_v16, -inf  ;;  %v1307_v22 = vsel %vm1288_vm6, %v1286_v15, -inf }
 0x418   : > { %v2648_v23 = vpop.f32.mrb[23].mxu1  ;;  %1311 = vmax.xlane.f32.xlu0 %v1310_v21  ;;  %1308 = vmax.xlane.f32.xlu1 %v1307_v22  ;;  %v2642_v25 = vpop.f32.mrb[11].mxu0 }
 0x426   : > { %v1291_v29 = vpop.xlane.xlu1 %1290 }
 0x427   : > { %v1313_v30 = vsub.f32 %v1280_v37, %v1291_v29 }
 0x429   : > { %2752 = vrot.lane.b32.xlu1 %v3139_v59, %s2928_s21  ;;  %v1321_v31 = vmul.f32 1.442695, %v1313_v30 }
 0x42e   : > { %v1294_v26 = vpop.xlane.xlu0 %1293 }
 0x42f   : > { %v1314_v27 = vsub.f32 %v1281_v42, %v1294_v26 }
 0x431   : > { %v1323_v28 = vmul.f32 1.442695, %v1314_v27 }
 0x433   : > { %2829 = vpow2.f32 %v1323_v28 }
 0x434   : > { %2831 = vpow2.f32 %v1321_v31 }
 0x43d   : > { %v2830_v32 = vpop.eup %2829 }
 0x43e   : > { %v1340_v33 = vsel %vm1288_vm6, %v2830_v32, 0.0  ;;  %v3229_v34 = vpop.eup %2831 }
 0x43f   : > { %1341 = vadd.xlane.f32.xlu0 %v1340_v33  ;;  %v1337_v35 = vsel %vm1288_vm6, %v3229_v34, 0.0 }
 0x44d   : > { %1338 = vadd.xlane.f32.xlu1 %v1337_v35 }
 0x495   : > { %v1297_v36 = vpop.xlane.xlu0 %1296 }
 0x496   : > { %v1315_v38 = vsub.f32 %v1282_v54, %v1297_v36 }
 0x498   : > { %v1325_v39 = vmul.f32 1.442695, %v1315_v38 }
 0x499   : > { %v1300_v40 = vpop.xlane.xlu0 %1299 }
 0x49a   : > { %2833 = vpow2.f32 %v1325_v39  ;;  %v1316_v41 = vsub.f32 %v1283_v61, %v1300_v40 }
 0x49c   : > { %v1327_v45 = vmul.f32 1.442695, %v1316_v41 }
 0x49d   : > { %v1306_v37 = vpop.xlane.xlu0 %1305  ;;  %v1303_v42 = vpop.xlane.xlu1 %1302 }
 0x49e   : > { %2835 = vpow2.f32 %v1327_v45  ;;  %v1318_v47 = vsub.f32 %v1285_v4, %v1306_v37  ;;  %v1317_v48 = vsub.f32 %v1284_v3, %v1303_v42 }
 0x4a0   : > { %v1331_v49 = vmul.f32 1.442695, %v1318_v47  ;;  %v1329_v50 = vmul.f32 1.442695, %v1317_v48 }
 0x4a2   : > { %2837 = vpow2.f32 %v1331_v49 }
 0x4a3   : > { %2839 = vpow2.f32 %v1329_v50 }
 0x4a4   : > { %v2834_v51 = vpop.eup %2833 }
 0x4a5   : > { %v1312_v53 = vpop.xlane.xlu0 %1311  ;;  %v1309_v55 = vpop.xlane.xlu1 %1308  ;;  %v1343_v56 = vsel %vm1288_vm6, %v2834_v51, 0.0 }
 0x4a6   : > { %v1320_v54 = vsub.f32 %v1287_v16, %v1312_v53  ;;  %v1319_v57 = vsub.f32 %v1286_v15, %v1309_v55  ;;  %1344 = vadd.xlane.f32.xlu1 %v1343_v56 }
 0x4a8   : > { %v2836_v58 = vpop.eup %2835  ;;  %v1335_v60 = vmul.f32 1.442695, %v1320_v54  ;;  %v1333_v61 = vmul.f32 1.442695, %v1319_v57 }
 0x4a9   : > { %v1346_v62 = vsel %vm1288_vm6, %v2836_v58, 0.0  ;;  %v2753_v8 = vpop.permute.xlu1 %2752 }
 0x4aa   : > { %2841 = vpow2.f32 %v1335_v60  ;;  %1347 = vadd.xlane.f32.xlu0 %v1346_v62  ;;  %v2755_v9 = vunpack.i.h.bf16 %v2753_v8 }
 0x4ab   : > { %2843 = vpow2.f32 %v1333_v61 }
 0x4ac   : > { %v3235_v63 = vpop.eup %2837  ;;  %v880_v11 = vpack.c.bf16 %v2755_v9, %v2755_v9  ;;  %v2793_v9 = vld [vmem:[%s3052_s14] sm:$0xff]  }
 0x4ad   : > { %v3237_v0 = vpop.eup %2839  ;;  %v1352_v1 = vsel %vm1288_vm6, %v3235_v63, 0.0 }
 0x4ae   : > { %1353 = vadd.xlane.f32.xlu0 %v1352_v1  ;;  %v1349_v2 = vsel %vm1288_vm6, %v3237_v0, 0.0  ;;  %v1528_v15 = vsel %vm1388_vm4, %v880_v11, 0 }
 0x4af   : > { %1350 = vadd.xlane.f32.xlu1 %v1349_v2 }
 0x4b4   : > { %v3243_v3 = vpop.eup %2841 }
 0x4b5   : > { %v3245_v4 = vpop.eup %2843  ;;  %v1358_v5 = vsel %vm1288_vm6, %v3243_v3, 0.0 }
 0x4b6   : > { %1359 = vadd.xlane.f32.xlu0 %v1358_v5  ;;  %v1355_v6 = vsel %vm1288_vm6, %v3245_v4, 0.0 }
 0x4b7   : > { %1356 = vadd.xlane.f32.xlu1 %v1355_v6 }
 0x4c8   : > { %2762 = vrot.lane.b32.xlu1 %v3139_v59, %s2930_s17 }
 0x4cc   : > { %2757 = vrot.lane.b32.xlu0 %v3139_v59, %s2927_s23  ;;  %v1342_v7 = vpop.xlane.xlu0 %1341  ;;  %v2754_v59 = vunpack.i.l.bf16 %v2753_v8 }
 0x4cd   : > { %2845 = vrcp.f32 %v1342_v7 }
 0x4ce   : > { %v879_v17 = vpack.c.bf16 %v2754_v59, %v2754_v59 }
 0x4d0   : > { %v1482_v20 = vsel %vm1388_vm4, %v879_v17, 0  ;;  %v2795_v17 = vld [vmem:[%s3052_s14 + $0x10] sm:$0xff]  }
 0x4d7   : > { %v2846_v10 = vpop.eup %2845 }
 0x4d8   : > { %v1370_v12 = vmul.f32 %v2846_v10, %v2830_v32 }
 0x4da   : > { %v1339_v13 = vpop.xlane.xlu1 %1338  ;;  %v1378_v14 = vpack.c.bf16 %v1370_v12, %v1370_v12 }
 0x4db   : > { %2847 = vrcp.f32 %v1339_v13 }
 0x4dc   : > { %2658 = vmatmul.mubr.msk.bf16.vlgmr.msra.gmra.mrb[24].mxu1 %vm1288_vm6, %v1378_v14  ;;  %v2794_v14 = vld [vmem:[%s3052_s14 + $0x8] sm:$0xff]  }
 0x4dd   : > { %2668 = vmatpush3.bf16.msra.mxu1 %v1528_v15  ;;  %2669 = vmatprep.mubr.msk.bf16.mxu1 %vm2929_vm2, %v2926_v52 }
 0x4de   : > { %2679 = vmatprep.subr.bf16.mxu1 %v2926_v52 }
 0x4e5   : > { %v2848_v16 = vpop.eup %2847 }
 0x4e6   : > { %v1369_v18 = vmul.f32 %v2848_v16, %v3229_v34 }
 0x4e8   : > { %v1377_v19 = vpack.c.bf16 %v1369_v18, %v1369_v18 }
 0x4ea   : > { %2652 = vmatmul.mubr.msk.bf16.vlgmr.msra.gmra.mrb[12].mxu0 %vm1288_vm6, %v1377_v19  ;;  %v2796_v19 = vld [vmem:[%s3052_s14 + $0x18] sm:$0xff]   ;;  %s2934_s14 = smov 48  }
 0x4eb   : > { %2662 = vmatpush3.bf16.msra.mxu0 %v1482_v20  ;;  %2663 = vmatprep.mubr.msk.bf16.mxu0 %vm2929_vm2, %v2926_v52 }
 0x4ec   : > { %2673 = vmatprep.subr.bf16.mxu0 %v2926_v52 }
 0x533   : > { %v1345_v21 = vpop.xlane.xlu1 %1344 }
 0x534   : > { %2849 = vrcp.f32 %v1345_v21 }
 0x537   : > { %v1348_v22 = vpop.xlane.xlu0 %1347 }
 0x538   : > { %2851 = vrcp.f32 %v1348_v22 }
 0x53b   : > { %v1354_v23 = vpop.xlane.xlu0 %1353 }
 0x53c   : > { %2853 = vrcp.f32 %v1354_v23  ;;  %v1351_v25 = vpop.xlane.xlu1 %1350 }
 0x53d   : > { %2855 = vrcp.f32 %v1351_v25 }
 0x53e   : > { %v2850_v26 = vpop.eup %2849 }
 0x53f   : > { %v1371_v27 = vmul.f32 %v2850_v26, %v2834_v51 }
 0x541   : > { %v1379_v28 = vpack.c.bf16 %v1371_v27, %v1371_v27 }
 0x542   : > { %v2852_v29 = vpop.eup %2851 }
 0x543   : > { %v1372_v30 = vmul.f32 %v2852_v29, %v2836_v58  ;;  %v1360_v31 = vpop.xlane.xlu0 %1359  ;;  %2664 = vmatmul.mubr.msk.bf16.vlgmr.msra.gmra.mrb[16].mxu0 %vm1288_vm6, %v1379_v28 }
 0x544   : > { %2857 = vrcp.f32 %v1360_v31  ;;  %v1357_v32 = vpop.xlane.xlu1 %1356  ;;  %2675 = vmatprep.mubr.msk.bf16.mxu0 %vm2929_vm2, %v2926_v52 }
 0x545   : > { %2859 = vrcp.f32 %v1357_v32  ;;  %v1380_v33 = vpack.c.bf16 %v1372_v30, %v1372_v30 }
 0x546   : > { %v2854_v34 = vpop.eup %2853 }
 0x547   : > { %v2856_v35 = vpop.eup %2855  ;;  %v2758_v36 = vpop.permute.xlu0 %2757  ;;  %2670 = vmatmul.mubr.msk.bf16.vlgmr.msra.gmra.mrb[28].mxu1 %vm1288_vm6, %v1380_v33  ;;  %v1374_v37 = vmul.f32 %v2854_v34, %v3235_v63 }
 0x548   : > { %v2760_v38 = vunpack.i.h.bf16 %v2758_v36  ;;  %v2759_v39 = vunpack.i.l.bf16 %v2758_v36  ;;  %v2763_v40 = vpop.permute.xlu1 %2762  ;;  %2681 = vmatprep.mubr.msk.bf16.mxu1 %vm2929_vm2, %v2926_v52  ;;  %v1373_v42 = vmul.f32 %v2856_v35, %v3237_v0 }
 0x549   : > { %v2765_v41 = vunpack.i.h.bf16 %v2763_v40  ;;  %v2764_v45 = vunpack.i.l.bf16 %v2763_v40  ;;  %v1382_v54 = vpack.c.bf16 %v1374_v37, %v1374_v37 }
 0x54a   : > { %v882_v47 = vpack.c.bf16 %v2760_v38, %v2760_v38  ;;  %v881_v48 = vpack.c.bf16 %v2759_v39, %v2759_v39  ;;  %v1381_v56 = vpack.c.bf16 %v1373_v42, %v1373_v42 }
 0x54b   : > { %v884_v49 = vpack.c.bf16 %v2765_v41, %v2765_v41  ;;  %v883_v50 = vpack.c.bf16 %v2764_v45, %v2764_v45 }
 0x54c   : > { %v1574_v51 = vsel %vm1388_vm4, %v881_v48, 0  ;;  %v1620_v53 = vsel %vm1388_vm4, %v882_v47, 0 }
 0x54d   : > { %2674 = vmatpush3.bf16.msra.mxu0 %v1574_v51  ;;  %2680 = vmatpush3.bf16.msra.mxu1 %v1620_v53  ;;  %v1666_v58 = vsel %vm1388_vm4, %v883_v50, 0  ;;  %v1712_v60 = vsel %vm1388_vm4, %v884_v49, 0 }
 0x54e   : > { %v2858_v55 = vpop.eup %2857  ;;  %2685 = vmatprep.subr.bf16.mxu0 %v2926_v52  ;;  %2691 = vmatprep.subr.bf16.mxu1 %v2926_v52 }
 0x54f   : > { %v2860_v57 = vpop.eup %2859  ;;  %v1376_v61 = vmul.f32 %v2858_v55, %v3243_v3 }
 0x550   : > { %2676 = vmatmul.mubr.msk.bf16.vlgmr.msra.gmra.mrb[20].mxu0 %vm1288_vm6, %v1381_v56  ;;  %2682 = vmatmul.mubr.msk.bf16.vlgmr.msra.gmra.mrb[32].mxu1 %vm1288_vm6, %v1382_v54  ;;  %v1375_v62 = vmul.f32 %v2860_v57, %v3245_v4 }
 0x551   : > { %2686 = vmatpush3.bf16.msra.mxu0 %v1666_v58  ;;  %2692 = vmatpush3.bf16.msra.mxu1 %v1712_v60  ;;  %v1384_v0 = vpack.c.bf16 %v1376_v61, %v1376_v61  ;;  %v2493_v58 = vld [vmem:[%s3446_s0] ss:$0 sm:$0xff] }
 0x552   : > { %2687 = vmatprep.mubr.msk.bf16.mxu0 %vm2929_vm2, %v2926_v52  ;;  %2693 = vmatprep.mubr.msk.bf16.mxu1 %vm2929_vm2, %v2926_v52  ;;  %v1383_v63 = vpack.c.bf16 %v1375_v62, %v1375_v62 }
 0x553   : > { %2697 = vmatprep.subr.bf16.mxu0 %v2926_v52 }
 0x558   : > { %2688 = vmatmul.mubr.msk.bf16.vlgmr.msra.gmra.mrb[24].mxu0 %vm1288_vm6, %v1383_v63  ;;  %2694 = vmatmul.mubr.msk.bf16.vlgmr.msra.gmra.mrb[36].mxu1 %vm1288_vm6, %v1384_v0  ;;  %v2881_v0 = vld [vmem:[#allocation2] sm:$0xff] }
 0x559   : > { %2705 = vmatprep.mubr.msk.bf16.mxu0 %vm2929_vm2, %v2926_v52  ;;  %2012 = vmatprep.mubr.bf16.mxu1 %v2925_v24 }
 0x55a   : > { %2698 = vmatpush3.bf16.msra.mxu0 %v2793_v9 }
 0x55b   : > { %2699 = vmatprep.subr.bf16.mxu0 %v2926_v52 }
 0x55e   : > { %2700 = vmatpush3.bf16.msra.mxu0 %v2794_v14 }
 0x55f   : > { %2701 = vmatprep.subr.bf16.mxu0 %v2926_v52 }
 0x562   : > { %2702 = vmatpush3.bf16.msra.mxu0 %v2795_v17  ;;  %v2797_v17 = vld [vmem:[%s3073_s18] ss:$8 sps:$4 sm:$0xff]  }
 0x563   : > { %2703 = vmatprep.subr.bf16.mxu0 %v2926_v52 }
 0x566   : > { %2704 = vmatpush3.bf16.msra.mxu0 %v2796_v19  ;;  %v2800_v19 = vld [vmem:[%s3073_s18 + $0x10] ss:$8 sps:$4 sm:$0xff]  }
 0x5af   : > { %v1472_v1 = vpop.f32.mrb[24].mxu1 }
 0x5b0   : > { %v2659_v2 = vpop.f32.mrb[25].mxu1 }
 0x5b1   : > { %v1475_v3 = vpop.f32.mrb[26].mxu1 }
 0x5b2   : > { %v2660_v4 = vpop.f32.mrb[27].mxu1 }
 0x5b3   : > { %v2882_v4 = vld [vmem:[#allocation2 + $0x8] sm:$0xff] }
 0x5bd   : > { %v1426_v5 = vpop.f32.mrb[12].mxu0 }
 0x5be   : > { %v2653_v6 = vpop.f32.mrb[13].mxu0 }
 0x5bf   : > { %v1429_v7 = vpop.f32.mrb[14].mxu0 }
 0x5c0   : > { %v2654_v8 = vpop.f32.mrb[15].mxu0 }
 0x616   : > { %v1518_v10 = vpop.f32.mrb[16].mxu0 }
 0x617   : > { %v2665_v11 = vpop.f32.mrb[17].mxu0 }
 0x618   : > { %v1521_v12 = vpop.f32.mrb[18].mxu0 }
 0x619   : > { %v2666_v13 = vpop.f32.mrb[19].mxu0 }
 0x61a   : > { %v1564_v24 = vpop.f32.mrb[28].mxu1 }
 0x61b   : > { %v2766_v15 = vpack.i.bf16 %v1564_v24, %v1518_v10  ;;  %v2671_v59 = vpop.f32.mrb[29].mxu1 }
 0x61c   : > { %v1567_v16 = vpop.f32.mrb[30].mxu1 }
 0x61d   : > { %v2672_v18 = vpop.f32.mrb[31].mxu1  ;;  %2767 = vrot.lane.b32.xlu1 %v2766_v15, %s2932_s15  ;;  %v2799_v16 = vld [vmem:[%s3073_s18 + $0x4] ss:$8 sps:$4 sm:$0xff]  }
 0x61e   : > { %1980 = vmatprep.subr.bf16.mxu1 %v2799_v16  ;;  %v2802_v18 = vld [vmem:[%s3073_s18 + $0x14] ss:$8 sps:$4 sm:$0xff]  }
 0x61f   : > { %1981 = vmatpush1.bf16.msra.mxu1 %v2797_v17 }
 0x620   : > { %1982 = vmatprep.subr.bf16.mxu1 %v2802_v18 }
 0x623   : > { %v1610_v20 = vpop.f32.mrb[20].mxu0  ;;  %v1656_v21 = vpop.f32.mrb[32].mxu1  ;;  %1983 = vmatpush1.bf16.msra.mxu1 %v2800_v19 }
 0x624   : > { %v2771_v22 = vpack.i.bf16 %v1656_v21, %v1610_v20  ;;  %v2677_v23 = vpop.f32.mrb[21].mxu0  ;;  %v2683_v25 = vpop.f32.mrb[33].mxu1  ;;  %v2805_v20 = vld [vmem:[%s3073_s18 + $0x24] ss:$8 sps:$4 sm:$0xff]   ;;  %v2803_v21 = vld [vmem:[%s3073_s18 + $0x20] ss:$8 sps:$4 sm:$0xff]  }
 0x625   : > { %v1613_v26 = vpop.f32.mrb[22].mxu0  ;;  %v1659_v27 = vpop.f32.mrb[34].mxu1  ;;  %1984 = vmatprep.subr.bf16.mxu1 %v2805_v20  ;;  %v2808_v23 = vld [vmem:[%s3073_s18 + $0x34] ss:$8 sps:$4 sm:$0xff]  }
 0x626   : > { %v2684_v28 = vpop.f32.mrb[35].mxu1  ;;  %2772 = vrot.lane.b32.xlu1 %v2771_v22, %s2933_s28  ;;  %v2678_v29 = vpop.f32.mrb[23].mxu0  ;;  %v2806_v22 = vld [vmem:[%s3073_s18 + $0x30] ss:$8 sps:$4 sm:$0xff]   ;;  %s3447_s18 = scalar_lea.vmem %s3416_s7, %s3030_s20 }
 0x627   : > { %1985 = vmatpush1.bf16.msra.mxu1 %v2803_v21 }
 0x628   : > { %1986 = vmatprep.subr.bf16.mxu1 %v2808_v23 }
 0x62b   : > { %v1702_v30 = vpop.f32.mrb[24].mxu0  ;;  %v1748_v31 = vpop.f32.mrb[36].mxu1  ;;  %1987 = vmatpush1.bf16.msra.mxu1 %v2806_v22 }
 0x62c   : > { %v2776_v32 = vpack.i.bf16 %v1748_v31, %v1702_v30  ;;  %v2689_v33 = vpop.f32.mrb[25].mxu0  ;;  %v2695_v34 = vpop.f32.mrb[37].mxu1 }
 0x62d   : > { %v1705_v35 = vpop.f32.mrb[26].mxu0  ;;  %v1751_v52 = vpop.f32.mrb[38].mxu1  ;;  %v2499_v33 = vld [vmem:[%s3447_s18] ss:$0 sm:$0xff] }
 0x62e   : > { %v2696_v36 = vpop.f32.mrb[39].mxu1  ;;  %2777 = vrot.lane.b32.xlu0 %v2776_v32, %s2934_s14  ;;  %v2690_v38 = vpop.f32.mrb[27].mxu0 }
 0x62f   : > { %v2500_v36 = vld [vmem:[%s641_s16] ss:$0 sm:$0xff] }
 0x68f   : > { %v2768_v39 = vpop.permute.xlu1 %2767 }
 0x690   : > { %v2770_v41 = vunpack.i.h.bf16 %v2768_v39  ;;  %v2769_v45 = vunpack.i.l.bf16 %v2768_v39 }
 0x692   : > { %v1779_v48 = vsel %vm888_vm3, %v1472_v1, %v2770_v41  ;;  %v1778_v49 = vsel %vm888_vm3, %v1426_v5, %v2769_v45  ;;  %v2809_v45 = vld [vmem:[%s3084_s2 + $0x40] sm:$0xff]  }
 0x693   : > { %2579 = vmatprep.subr.bf16.mxu0 %v2809_v45 }
 0x698   : > { %v2773_v40 = vpop.permute.xlu1 %2772 }
 0x699   : > { %v2775_v37 = vunpack.i.h.bf16 %v2773_v40  ;;  %v2774_v42 = vunpack.i.l.bf16 %v2773_v40 }
 0x69b   : > { %v1782_v53 = vsel %vm1780_vm7, %v1779_v48, %v2775_v37  ;;  %v1781_v55 = vsel %vm1780_vm7, %v1778_v49, %v2774_v42  ;;  %v2810_v37 = vld [vmem:[%s3084_s2] sm:$0xff]   ;;  %v2811_v42 = vld [vmem:[%s3084_s2 + $0x48] sm:$0xff]   ;;  %v2813_v48 = vld [vmem:[%s3084_s2 + $0x50] sm:$0xff]  }
 0x69c   : > { %v2814_v49 = vld [vmem:[%s3084_s2 + $0x10] sm:$0xff]  }
 0x6a0   : > { %v2778_v47 = vpop.permute.xlu0 %2777 }
 0x6a1   : > { %v2780_v50 = vunpack.i.h.bf16 %v2778_v47  ;;  %v2779_v51 = vunpack.i.l.bf16 %v2778_v47  ;;  %v2812_v47 = vld [vmem:[%s3084_s2 + $0x8] sm:$0xff]  }
 0x6a3   : > { %v1785_v56 = vsel %vm1783_vm8, %v1782_v53, %v2780_v50  ;;  %v1784_v54 = vsel %vm1783_vm8, %v1781_v55, %v2779_v51  ;;  %v2815_v50 = vld [vmem:[%s3084_s2 + $0x58] sm:$0xff]   ;;  %v2817_v53 = vld [vmem:[%s3084_s2 + $0x60] sm:$0xff]  }
 0x6a4   : > { %v1786_v57 = vpack.c.bf16 %v1785_v56, %v1784_v54  ;;  %v2816_v51 = vld [vmem:[%s3084_s2 + $0x18] sm:$0xff]   ;;  %v2818_v55 = vld [vmem:[%s3084_s2 + $0x20] sm:$0xff]   ;;  %v2819_v56 = vld [vmem:[%s3084_s2 + $0x68] sm:$0xff]  }
 0x6a5   : > { %v2820_v54 = vld [vmem:[%s3084_s2 + $0x28] sm:$0xff]  }
 0x6a6   : > { %2706 = vmatmul.mubr.msk.bf16.vlgmr.msra.gmra.mrb[28].mxu0 %vm678_vm1, %v1786_v57  ;;  %v2821_v57 = vld [vmem:[%s3084_s2 + $0x70] sm:$0xff]  }
 0x6a7   : > { %2580 = vmatpush3.bf16.msra.mxu0 %v2810_v37 }
 0x6a8   : > { %2581 = vmatprep.subr.bf16.mxu0 %v2811_v42 }
 0x6ab   : > { %2582 = vmatpush3.bf16.msra.mxu0 %v2812_v47 }
 0x6ac   : > { %2583 = vmatprep.subr.bf16.mxu0 %v2813_v48 }
 0x6af   : > { %2584 = vmatpush3.bf16.msra.mxu0 %v2814_v49 }
 0x6b0   : > { %2585 = vmatprep.subr.bf16.mxu0 %v2815_v50 }
 0x6b3   : > { %2586 = vmatpush3.bf16.msra.mxu0 %v2816_v51 }
 0x6b4   : > { %2587 = vmatprep.subr.bf16.mxu0 %v2817_v53 }
 0x6b7   : > { %2588 = vmatpush3.bf16.msra.mxu0 %v2818_v55 }
 0x6b8   : > { %2589 = vmatprep.subr.bf16.mxu0 %v2819_v56 }
 0x6bb   : > { %2590 = vmatpush3.bf16.msra.mxu0 %v2820_v54 }
 0x6bc   : > { %2591 = vmatprep.subr.bf16.mxu0 %v2821_v57 }
 0x779   : > { %v1863_v60 = vpop.f32.mrb[28].mxu0 }
 0x77a   : > { %v1864_v61 = vadd.f32 %v2493_v58, %v1863_v60  ;;  %v2707_v62 = vpop.f32.mrb[29].mxu0  ;;  %v2823_v60 = vld [vmem:[%s3084_s2 + $0x78] sm:$0xff]  }
 0x77b   : > { %v1866_v63 = vpop.f32.mrb[30].mxu0  ;;  %v1925_v62 = vld [vmem:[%s3078_s13] sm:$0x3] }
 0x77c   : > { %v3309_v1 = vadd.f32 %v2881_v0, %v1864_v61  ;;  %v1867_v2 = vadd.f32 %v2493_v58, %v1866_v63  ;;  %v2708_v3 = vpop.f32.mrb[31].mxu0  ;;  %v2822_v58 = vld [vmem:[%s3084_s2 + $0x30] sm:$0xff]   ;;  %v2824_v61 = vld [vmem:[%s3084_s2 + $0x38] sm:$0xff]   ;;  %v1930_v63 = vrot.slane %v1925_v62, %v735_v44  ;;  %v1934_v0 = vrot.slane %v1925_v62, %v739_v46 }
 0x77d   : > { %2592 = vmatpush3.bf16.msra.mxu0 %v2822_v58 }
 0x77e   : > { %v3311_v5 = vadd.f32 %v2882_v4, %v1867_v2  ;;  %v1874_v6 = vsel %vm678_vm1, %v3309_v1, 0.0  ;;  %2593 = vmatprep.subr.bf16.mxu0 %v2823_v60 }
 0x77f   : > { %1875 = vadd.xlane.f32.xlu1 %v1874_v6 }
 0x780   : > { %v1877_v7 = vsel %vm678_vm1, %v3311_v5, 0.0 }
 0x781   : > { %1878 = vadd.xlane.f32.xlu0 %v1877_v7  ;;  %2594 = vmatpush3.bf16.msra.mxu0 %v2824_v61 }
 0x80c   : > { %v1876_v8 = vpop.xlane.xlu1 %1875 }
 0x80d   : > { %v1880_v9 = vmul.f32 0.015625, %v1876_v8 }
 0x80e   : > { %v1879_v10 = vpop.xlane.xlu0 %1878 }
 0x80f   : > { %v1882_v11 = vsub.f32 %v3309_v1, %v1880_v9  ;;  %v1881_v12 = vmul.f32 0.015625, %v1879_v10 }
 0x811   : > { %v1883_v13 = vsub.f32 %v3311_v5, %v1881_v12  ;;  %v1884_v24 = vmul.f32 %v1882_v11, %v1882_v11 }
 0x813   : > { %v1886_v14 = vsel %vm678_vm1, %v1884_v24, 0.0  ;;  %v1885_v15 = vmul.f32 %v1883_v13, %v1883_v13 }
 0x814   : > { %1887 = vadd.xlane.f32.xlu0 %v1886_v14 }
 0x815   : > { %v1889_v59 = vsel %vm678_vm1, %v1885_v15, 0.0 }
 0x818   : > { %1890 = vadd.xlane.f32.xlu0 %v1889_v59 }
 0x8a1   : > { %v1888_v25 = vpop.xlane.xlu0 %1887 }
 0x8a2   : > { %v1892_v26 = vmul.f32 0.015625, %v1888_v25 }
 0x8a4   : > { %v1894_v27 = vadd.f32 1e-05, %v1892_v26 }
 0x8a5   : > { %v1891_v28 = vpop.xlane.xlu0 %1890 }
 0x8a6   : > { %2861 = vrsqrt.f32 %v1894_v27  ;;  %v1893_v29 = vmul.f32 0.015625, %v1891_v28 }
 0x8a8   : > { %v1895_v30 = vadd.f32 1e-05, %v1893_v29 }
 0x8aa   : > { %2863 = vrsqrt.f32 %v1895_v30 }
 0x8b0   : > { %v2862_v31 = vpop.eup %2861 }
 0x8b1   : > { %v1898_v32 = vmul.f32 %v2862_v31, %v1882_v11 }
 0x8b3   : > { %v1906_v35 = vmul.f32 %v2499_v33, %v1898_v32 }
 0x8b4   : > { %v2864_v34 = vpop.eup %2863 }
 0x8b5   : > { %v1899_v52 = vmul.f32 %v2864_v34, %v1883_v13  ;;  %v1914_v39 = vadd.f32 %v2500_v36, %v1906_v35 }
 0x8b7   : > { %v1907_v38 = vmul.f32 %v2499_v33, %v1899_v52 }
 0x8b9   : > { %v1915_v40 = vadd.f32 %v2500_v36, %v1907_v38  ;;  %v2530_v36 = vld [vmem:[%s658_s25] ss:$0 sm:$0xff]  ;;  %s3448_s25 = sld [smem:[#allocation12_spill]] (!%p2531_p5) }
 0x8bb   : > { %v1916_v41 = vpack.c.bf16 %v1915_v40, %v1914_v39 }
 0x8bd   : > { %2509 = vmatmul.mubr.msk.bf16.vlgmr.msra.gmra.mrb[40].mxu1 %vm678_vm1, %v1916_v41 }
 0x990   : > { %v2014_v2 = vpop.f32.mrb[40].mxu1 }
 0x991   : > { %v2015_v3 = vadd.f32 %v2014_v2, %v1930_v63  ;;  %v2016_v4 = vpop.f32.mrb[41].mxu1  ;;  %v2532_v2 = vld [vmem:[%s3448_s25] ss:$0 sm:$0xff] (!%p2531_p5) }
 0x992   : > { %v2017_v6 = vadd.f32 %v2016_v4, %v1934_v0  ;;  %v2018_v7 = vpop.f32.mrb[42].mxu1  ;;  %v2533_v4 = vld [vmem:[%s3449_s22] ss:$0 sm:$0xff] (!%p2531_p5) }
 0x993   : > { %v2510_v8 = vmul.f32 -1.702, %v2015_v3  ;;  %v2019_v9 = vadd.f32 %v2018_v7, %v1930_v63  ;;  %v2020_v10 = vpop.f32.mrb[43].mxu1 }
 0x994   : > { %v2511_v11 = vmul.f32 -1.702, %v2017_v6  ;;  %v2021_v12 = vadd.f32 %v2020_v10, %v1934_v0 }
 0x995   : > { %v2031_v13 = vmul.f32 1.442695, %v2510_v8  ;;  %v2512_v24 = vmul.f32 -1.702, %v2019_v9 }
 0x996   : > { %v2033_v14 = vmul.f32 1.442695, %v2511_v11  ;;  %v2513_v15 = vmul.f32 -1.702, %v2021_v12 }
 0x997   : > { %2865 = vpow2.f32 %v2031_v13  ;;  %v2035_v59 = vmul.f32 1.442695, %v2512_v24 }
 0x998   : > { %2867 = vpow2.f32 %v2033_v14  ;;  %v2037_v44 = vmul.f32 1.442695, %v2513_v15 }
 0x999   : > { %2869 = vpow2.f32 %v2035_v59 }
 0x99a   : > { %2871 = vpow2.f32 %v2037_v44 }
 0x9a1   : > { %v2866_v43 = vpop.eup %2865 }
 0x9a2   : > { %v2868_v46 = vpop.eup %2867  ;;  %v2039_v16 = vadd.f32 1.0, %v2866_v43 }
 0x9a3   : > { %v2870_v17 = vpop.eup %2869  ;;  %v2040_v18 = vadd.f32 1.0, %v2868_v46 }
 0x9a4   : > { %v2872_v19 = vpop.eup %2871  ;;  %2873 = vrcp.f32 %v2039_v16  ;;  %v2041_v20 = vadd.f32 1.0, %v2870_v17 }
 0x9a5   : > { %2875 = vrcp.f32 %v2040_v18  ;;  %v2042_v21 = vadd.f32 1.0, %v2872_v19 }
 0x9a6   : > { %2877 = vrcp.f32 %v2041_v20 }
 0x9a7   : > { %2879 = vrcp.f32 %v2042_v21 }
 0x9ae   : > { %v2874_v22 = vpop.eup %2873 }
 0x9af   : > { %v2876_v23 = vpop.eup %2875  ;;  %v2051_v27 = vmul.f32 %v2874_v22, %v2015_v3 }
 0x9b0   : > { %v2878_v25 = vpop.eup %2877  ;;  %v2052_v29 = vmul.f32 %v2876_v23, %v2017_v6 }
 0x9b1   : > { %v2880_v26 = vpop.eup %2879  ;;  %v2053_v28 = vmul.f32 %v2878_v25, %v2019_v9 }
 0x9b2   : > { %v2054_v30 = vmul.f32 %v2880_v26, %v2021_v12 }
 0x9b3   : > { %v2055_v31 = vpack.c.bf16 %v2053_v28, %v2051_v27 }
 0x9b4   : > { %v2056_v32 = vpack.c.bf16 %v2054_v30, %v2052_v29 }
 0x9b6   : > { %2217 = vmatprep.mubr.bf16.mxu0 %v2056_v32 }
 0x9b7   : > { %2218 = vmatmul.mubr.bf16.vlgmr.msra.gmra.mrb[32].mxu0 %v2055_v31 }
 0xa8a   : > { %v2595_v33 = vpop.f32.mrb[32].mxu0 }
 0xa8b   : > { %v2596_v34 = vpop.f32.mrb[33].mxu0 }
 0xa8c   : > { %v2597_v35 = vadd.f32 %v2596_v34, %v2595_v33  ;;  %v2598_v52 = vpop.f32.mrb[34].mxu0 }
 0xa8d   : > { %v2599_v38 = vpop.f32.mrb[35].mxu0 }
 0xa8e   : > { %v2226_v39 = vadd.f32 %v2597_v35, %v3309_v1  ;;  %v2600_v40 = vadd.f32 %v2599_v38, %v2598_v52  ;;  %2242 = sbr.rel (%p2531_p5) target bundleno = 3024 (0xbd0), region = 88 }
 0xa90   : > { %v2235_v41 = vadd.f32 %v2530_v36, %v2226_v39  ;;  %v2227_v45 = vadd.f32 %v2600_v40, %v3311_v5 }
 0xa92   : > { %2237 = vst.msk [vmem:[#allocation2] sm:$0xff] %vm678_vm1, %v2235_v41  ;;  %v2236_v37 = vadd.f32 %v2530_v36, %v2227_v45  ;;  %v2245_v42 = vsel (!%p2531_p5), %vm678_vm1, %v2235_v41, 0.0 }
 0xa93   : > { %2246 = vadd.xlane.f32.xlu0 (!%p2531_p5), %v2245_v42 }
 0xa94   : > { %2238 = vst.msk [vmem:[#allocation2 + $0x8] sm:$0xff] %vm678_vm1, %v2236_v37  ;;  %v2248_v47 = vsel (!%p2531_p5), %vm678_vm1, %v2236_v37, 0.0 }
 0xa97   : > { %2249 = vadd.xlane.f32.xlu0 %v2248_v47 }
 0xb20   : > { %v2247_v48 = vpop.xlane.xlu0 %2246 }
 0xb21   : > { %v2251_v1 = vmul.f32 0.015625, %v2247_v48 }
 0xb23   : > { %v2253_v49 = vsub.f32 %v2235_v41, %v2251_v1 }
 0xb24   : > { %v2250_v50 = vpop.xlane.xlu0 %2249 }
 0xb25   : > { %v2252_v51 = vmul.f32 0.015625, %v2250_v50  ;;  %v2255_v5 = vmul.f32 %v2253_v49, %v2253_v49 }
 0xb27   : > { %v2254_v53 = vsub.f32 %v2236_v37, %v2252_v51  ;;  %v2257_v55 = vsel %vm678_vm1, %v2255_v5, 0.0 }
 0xb28   : > { %2258 = vadd.xlane.f32.xlu1 %v2257_v55 }
 0xb29   : > { %v2256_v56 = vmul.f32 %v2254_v53, %v2254_v53 }
 0xb2b   : > { %v2260_v54 = vsel %vm678_vm1, %v2256_v56, 0.0 }
 0xb2c   : > { %2261 = vadd.xlane.f32.xlu1 %v2260_v54 }
 0xbb5   : > { %v2259_v57 = vpop.xlane.xlu1 %2258 }
 0xbb6   : > { %v2263_v58 = vmul.f32 0.015625, %v2259_v57 }
 0xbb8   : > { %v2265_v60 = vadd.f32 1e-05, %v2263_v58 }
 0xbb9   : > { %v2262_v61 = vpop.xlane.xlu1 %2261 }
 0xbba   : > { %2883 = vrsqrt.f32 %v2265_v60  ;;  %v2264_v62 = vmul.f32 0.015625, %v2262_v61 }
 0xbbc   : > { %v2266_v63 = vadd.f32 1e-05, %v2264_v62 }
 0xbbe   : > { %2885 = vrsqrt.f32 %v2266_v63 }
 0xbc4   : > { %v2884_v0 = vpop.eup %2883 }
 0xbc5   : > { %v2269_v3 = vmul.f32 %v2884_v0, %v2253_v49 }
 0xbc7   : > { %v2277_v6 = vmul.f32 %v2532_v2, %v2269_v3 }
 0xbc8   : > { %v2886_v7 = vpop.eup %2885 }
 0xbc9   : > { %v2285_v8 = vadd.f32 %v2533_v4, %v2277_v6  ;;  %v2270_v9 = vmul.f32 %v2886_v7, %v2254_v53 }
 0xbcb   : > { %2287 = vst.msk [vmem:[#allocation3] sm:$0xff] %vm678_vm1, %v2285_v8  ;;  %v2278_v10 = vmul.f32 %v2532_v2, %v2270_v9 }
 0xbcd   : > { %v2286_v11 = vadd.f32 %v2533_v4, %v2278_v10 }
 0xbcf   : > { %2288 = vst.msk [vmem:[#allocation3 + $0x8] sm:$0xff] %vm678_vm1, %v2286_v11 }
 0xbd0 PF: > { %p2713_p6 = scmp.eq.s32.totalorder %s3024_s19, 1  ;;  %s2935_s15 = smov [#allocation3]  }
 0xbd1   : > { %s2295_s28 = sshll.u32 %s2935_s15, 4  ;;  %s2296_s28 = int_to_ptr.vmem [resolvable:$true] %s2295_s28 }
 0xbd2   : > { %s2887_s14 = scalar_lea.vmem %s2296_s28, 256  ;;  %p2894_p10 = scmp.lt.s32.totalorder %s2296_s28, %s2296_s28 }
 0xbd3   : > { %p2888_p7 = scmp.ne.s32.totalorder %s2296_s28, %s2887_s14  ;;  %p2895_p11 = scmp.lt.s32.totalorder %s2887_s14, %s2887_s14 }
 0xbd5   : > { %p2889_p8 = pnand %p2888_p7, %p2713_p6  ;;  %p2896_p12 = por %p2895_p11, %p2894_p10 }
 0xbd7   : > { %p2890_p9 = pneg %p2889_p8 }
 0xbd9   : > { %p2897_p13 = pnand %p2896_p12, %p2890_p9 }
 0xbdb   : > { %2900 = shalt.err (!%p2897_p13)
}
 0xbdc   : > { %s3450_s0 = sld [smem:[#allocation14_spill]] }
 0xbe2   : > { %s2901_s1 = scalar_lea.hbm %s3450_s0, 256 }
 0xbe3   : > { %p2902_p0 = scmp.ne.s32.totalorder %s3450_s0, %s2901_s1  ;;  %p2907_p3 = scmp.lt.u32.totalorder %s2901_s1, %s3450_s0 }
 0xbe5   : > { %p2903_p1 = pnand %p2902_p0, %p2713_p6 }
 0xbe7   : > { %p2904_p2 = pneg %p2903_p1 }
 0xbe9   : > { %p2909_p4 = pnand %p2907_p3, %p2904_p2 }
 0xbeb   : > { %2912 = shalt.err (!%p2909_p4)
}
 0xbec   : > { %s2936_s16 = smov 128   ;;  %s2937_s13 = smov 8  }
 0xbed   : > { %2710 = dma.vmem_to_hbm [thread:$0]  (%p2713_p6), %s2296_s28, 256, %s3450_s0, [#allocation4], %s2936_s16, %s2936_s16, %s2937_s13  }
 0xbee   : > { %2918 = dma.done.wait (%p2713_p6), [#allocation4], 256  }
 0xbef   : > { %2920 = vsyncadd (%p2713_p6), [#allocation4], 4294967040 }
 0xbf0 PF: > { %s3451_s25 = sld [smem:[#allocation6_spill]] }
 0xbf6   : > { %s26_s18 = sadd.s32 1, %s3451_s25  }
 0xbf7   : > { %p23_p5 = scmp.ge.s32.totalorder %s26_s18, 4  }
 0xbf9   :  { %25 = sbr.rel (!%p23_p5) target bundleno = 8 (0x8), region = 148 }
 0xc00   :  { %2311 = vsyncpa [#allocation4], 1 }
 0xc01   :  { %2313 = vsyncpa [#allocation4 + $0x1], 1 }

</bundles_post_ra>
